<compile_context>
chip_gen: v7x
topology: tpu7x:2x2x1
jax: 0.10.0
libtpu: 0.0.40
codegen_flags: <defaults>
</compile_context>

<pallas_src>
import functools

import jax
import jax.numpy as jnp
from jax.experimental import pallas as pl
from jax.experimental.pallas import tpu as pltpu


def _round_up(x: int, m: int) -> int:
    return (x + m - 1) // m * m


def _tpu_vmem_capacity_bytes() -> int:
    """Generation-aware VMEM capacity (128 MiB v5e/v6e, 64 MiB per core v7x)."""
    try:
        info = pltpu.get_tpu_info()
        for attr in ("vmem_capacity_bytes", "vmem_size_bytes", "vmem_bytes"):
            cap = getattr(info, attr, None)
            if cap:
                return int(cap)
    except Exception:
        pass
    return 64 * 1024 * 1024   # conservative default (v7x per-TensorCore VMEM)


# ------------------------------ fused kernel --------------------------------
def _lgcn_fused_kernel(ego_hbm, adj_in, out_ref, *scratch,
                       tm, tk, inv_layers, adj_resident):
    """grid = (n_layers, N_pad // tm, nk)   (layer, row tile, k tile; k fastest).

    ego_hbm : (N_pad, D_pad) f32  raw HBM ref (memory_space=ANY), read once.
    adj_in  : resident mode -> (N_pad, N_pad) bf16 raw HBM ref (staged into a
              VMEM scratch at the first grid step and reused by every layer);
              streaming mode -> (tm, tk) bf16 tile delivered by the pipeline.
    out_ref : (N_pad, D_pad) f32  resident output block == running layer sum.
    scratch : [adj_vmem (resident mode only)], e0, e1 (bf16 ping-pong layer
              activations), acc ((tm, D_pad) f32 k-reduction accumulator).
    """
    if adj_resident:
        adj_vmem, e0_ref, e1_ref, acc_ref = scratch
    else:
        e0_ref, e1_ref, acc_ref = scratch
        adj_vmem = None

    l = pl.program_id(0)
    i = pl.program_id(1)
    k = pl.program_id(2)
    nl = pl.num_programs(0)
    nk = pl.num_programs(2)

    # One-time init (first grid step): seed the running layer sum with the f32
    # ego straight from HBM (no resident f32 ego copy), build its bf16 shadow
    # (the layer-0 MXU operand, cast exactly once), and stage the adjacency
    # into VMEM if it is kept resident.
    @pl.when((l == 0) & (i == 0) & (k == 0))
    def _init():
        pltpu.sync_copy(ego_hbm, out_ref)
        e1_ref[...] = out_ref[...].astype(jnp.bfloat16)
        if adj_resident:
            pltpu.sync_copy(adj_in, adj_vmem)

    row = pl.ds(pl.multiple_of(i * tm, tm), tm)
    col = pl.ds(pl.multiple_of(k * tk, tk), tk)
    first_k = k == 0
    last_k = k == nk - 1

    if adj_resident:
        a_tile = adj_vmem[row, :]          # tk == N_pad in resident mode
    else:
        a_tile = adj_in[...]

    def layer_step(src_ref, dst_ref):
        # (tm, tk) bf16 @ (tk, D_pad) bf16 -> (tm, D_pad) f32 on the MXU.
        partial = jnp.dot(a_tile, src_ref[col, :],
                          preferred_element_type=jnp.float32)

        @pl.when(first_k)
        def _():
            acc_ref[...] = partial

        @pl.when(k > 0)
        def _():
            acc_ref[...] += partial

        # Row tile of this layer finished: publish the bf16 shadow for the
        # next layer's matmul and fold the f32 value into the running sum.
        @pl.when(last_k)
        def _():
            done = acc_ref[...]
            dst_ref[row, :] = done.astype(jnp.bfloat16)
            out_ref[row, :] += done

    # Ping-pong on layer parity (static leading refs only): even layers read
    # e1 / write e0, odd layers read e0 / write e1 (layer 0's source e1 is
    # seeded in _init).
    @pl.when((l % 2) == 0)
    def _even():
        layer_step(e1_ref, e0_ref)

    @pl.when((l % 2) == 1)
    def _odd():
        layer_step(e0_ref, e1_ref)

    # Final epilogue: running sum -> mean over the (n_layers + 1) embeddings.
    @pl.when((l == nl - 1) & last_k)
    def _finalize():
        out_ref[row, :] = out_ref[row, :] * inv_layers


# --------------------------- LGCN encoder forward ----------------------------
@functools.partial(jax.jit,
                   static_argnames=("n_layers", "n_users", "adj_resident", "tile"))
def lgcn_encoder_forward(norm_adj, user_emb, item_emb, *, n_layers, n_users,
                         adj_resident=None, tile=None):
    """JAX/Pallas equivalent of LGCN_Encoder.forward().

    adj_resident: None -> auto (keep the dense adjacency resident in VMEM when
                  it fits); True/False force the mode (False = stream tiles).
    tile:         row/col tile size (multiple of 128); None -> auto.
    """
    ego = jnp.concatenate([user_emb.astype(jnp.float32),
                           item_emb.astype(jnp.float32)], axis=0)
    N, D = ego.shape
    if n_layers == 0:
        return ego[:n_users], ego[n_users:]

    # ---- layout plumbing (outside the kernel) -------------------------------
    D_pad = _round_up(D, 128)                           # lane-dense feature axis
    if tile is None:
        tile = 512 if _round_up(N, 256) % 512 == 0 else 256
    if tile % 128 != 0 or tile <= 0:
        raise ValueError("tile must be a positive multiple of 128")
    N_pad = _round_up(N, max(tile, 256))

    # ---- generation-aware VMEM budget ---------------------------------------
    usable = int(_tpu_vmem_capacity_bytes() * 0.8)
    emb_bytes = 2 * N_pad * D_pad * 4      # resident out block (double-buffered)
    emb_bytes += 2 * N_pad * D_pad * 2     # e0 + e1 bf16 ping-pong scratch
    emb_bytes += tile * D_pad * 4          # f32 k-reduction accumulator
    adj_res_bytes = N_pad * N_pad * 2      # whole bf16 adjacency, single copy
    adj_stream_bytes = 2 * tile * tile * 2  # double-buffered streamed tiles
    margin = 4 * 1024 * 1024
    if adj_resident is None:
        adj_resident = emb_bytes + adj_res_bytes + margin <= usable
    total = emb_bytes + (adj_res_bytes if adj_resident else adj_stream_bytes)
    if total + margin > usable:
        # TODO(synk): for graphs whose embeddings alone exceed VMEM, fall back
        # to a per-layer streaming kernel or a CSR/gather formulation instead
        # of the fused resident-E design.
        raise ValueError(
            f"LightGCN fused kernel needs ~{total} B of VMEM, only {usable} B usable")
    vmem_limit = min(usable, max(total + 8 * 1024 * 1024, 32 * 1024 * 1024))

    tm = tile
    tk = N_pad if adj_resident else tile
    nk = 1 if adj_resident else N_pad // tile

    ego_p = jnp.pad(ego, ((0, N_pad - N), (0, D_pad - D)))
    # bf16 adjacency halves the dominant HBM stream / resident footprint.
    # TODO(synk): int8 (v5e/v6e MXU) or fp8-e4m3 (v7x MXU) adjacency with
    # per-row scales would halve the dominant stream again; the symmetric
    # upper-triangle trick would halve it once more.
    adj_p = jnp.pad(norm_adj.astype(jnp.bfloat16),
                    ((0, N_pad - N), (0, N_pad - N)))

    in_specs = [pl.BlockSpec(memory_space=pl.ANY)]      # ego stays in HBM
    scratch_shapes = []
    if adj_resident:
        in_specs.append(pl.BlockSpec(memory_space=pl.ANY))   # adjacency in HBM
        scratch_shapes.append(pltpu.VMEM((N_pad, N_pad), jnp.bfloat16))
    else:
        # Streamed (tm, tk) adjacency tiles, re-fetched once per layer.
        # TODO(synk): pipeline_mode=pl.Buffered(3) here would hide more of the
        # HBM latency of the dominant adjacency stream.
        in_specs.append(pl.BlockSpec((tm, tk), lambda l, i, k: (i, k)))
    scratch_shapes += [
        pltpu.VMEM((N_pad, D_pad), jnp.bfloat16),   # e0 (layer ping-pong)
        pltpu.VMEM((N_pad, D_pad), jnp.bfloat16),   # e1 (layer ping-pong)
        pltpu.VMEM((tm, D_pad), jnp.float32),       # f32 k-reduction accumulator
    ]

    kernel = functools.partial(
        _lgcn_fused_kernel, tm=tm, tk=tk,
        inv_layers=1.0 / float(n_layers + 1), adj_resident=adj_resident)

    all_emb = pl.pallas_call(
        kernel,
        out_shape=jax.ShapeDtypeStruct((N_pad, D_pad), jnp.float32),
        grid_spec=pltpu.PrefetchScalarGridSpec(
            num_scalar_prefetch=0,
            grid=(n_layers, N_pad // tm, nk),
            in_specs=in_specs,
            # TODO(synk): pipeline_mode=pl.Buffered(1) on this constant-index
            # output (plus input_output_aliases on the padded ego buffer) would
            # shave one more N_pad*D_pad*4 VMEM buffer / one HBM allocation.
            out_specs=pl.BlockSpec((N_pad, D_pad), lambda l, i, k: (0, 0)),
            scratch_shapes=scratch_shapes,
        ),
        # Every grid axis carries a dependency (layer l+1 reads all row tiles
        # of layer l), so all axes must stay "arbitrary" / sequential.
        # TODO(synk): on v7x (2 TensorCores) shard the row axis explicitly via
        # pl.core_map + a per-layer pltpu.core_barrier to use both cores.
        compiler_params=pltpu.CompilerParams(
            dimension_semantics=("arbitrary", "arbitrary", "arbitrary"),
            vmem_limit_bytes=vmem_limit,
        ),
    )(ego_p, adj_p)

    all_emb = all_emb[:N, :D]
    return all_emb[:n_users], all_emb[n_users:]


# --------------------------- deterministic setup ------------------------------
def xavier_uniform(key, shape, dtype=jnp.float32):
    fan_in, fan_out = shape
    bound = (6.0 / (fan_in + fan_out)) ** 0.5
    return jax.random.uniform(key, shape, dtype, minval=-bound, maxval=bound)


def build_norm_adj(key, n_users, n_items, density=0.1):
    """Symmetric-normalized bipartite adjacency D^-1/2 A D^-1/2, stored bf16."""
    N = n_users + n_items
    r = (jax.random.uniform(key, (n_users, n_items)) < density).astype(jnp.float32)
    adj = jnp.zeros((N, N), jnp.float32)
    adj = adj.at[:n_users, n_users:].set(r)
    adj = adj.at[n_users:, :n_users].set(r.T)
    deg = jnp.sum(adj, axis=1)
    d_inv_sqrt = jnp.where(deg > 0, 1.0 / jnp.sqrt(jnp.maximum(deg, 1e-12)), 0.0)
    norm = adj * d_inv_sqrt[:, None] * d_inv_sqrt[None, :]
    # TODO(synk): real LightGCN adjacencies are <<1% dense; a CSR formulation
    # with scalar-prefetched row offsets would avoid the dense O(N^2) stream.
    return norm.astype(jnp.bfloat16)


if __name__ == "__main__":
    # Small, TPU-tile-friendly sizes: N = n_users + n_items = 256, emb = 64.
    n_users, n_items, emb_size, n_layers = 112, 144, 64, 3

    key = jax.random.PRNGKey(0)
    k_adj, k_u, k_i = jax.random.split(key, 3)

    norm_adj = build_norm_adj(k_adj, n_users, n_items)       # (256, 256) bf16
    user_emb = xavier_uniform(k_u, (n_users, emb_size))      # (112, 64) f32
    item_emb = xavier_uniform(k_i, (n_items, emb_size))      # (144, 64) f32

    # Reference: same math as the PyTorch forward, with the same bf16 operand
    # rounding as the kernel's MXU matmuls (f32 accumulation).
    adj_f32 = norm_adj.astype(jnp.float32)
    ego = jnp.concatenate([user_emb, item_emb], axis=0)
    outs = [ego]
    cur = ego
    for _ in range(n_layers):
        cur = jnp.matmul(adj_f32,
                         cur.astype(jnp.bfloat16).astype(jnp.float32),
                         precision=jax.lax.Precision.HIGHEST)
        outs.append(cur)
    ref = jnp.mean(jnp.stack(outs, axis=1), axis=1)

    def check(u, it, tag):
        du = float(jnp.max(jnp.abs(u - ref[:n_users])))
        di = float(jnp.max(jnp.abs(it - ref[n_users:])))
        assert jnp.allclose(u, ref[:n_users], atol=5e-4, rtol=2e-3), (tag, du)
        assert jnp.allclose(it, ref[n_users:], atol=5e-4, rtol=2e-3), (tag, di)

    # 1) default path: adjacency resident in VMEM at this size.
    u1, i1 = lgcn_encoder_forward(norm_adj, user_emb, item_emb,
                                  n_layers=n_layers, n_users=n_users)
    jax.block_until_ready((u1, i1))
    check(u1, i1, "auto")

    # 2) adjacency-resident path with small tiles (multiple row tiles).
    u2, i2 = lgcn_encoder_forward(norm_adj, user_emb, item_emb,
                                  n_layers=n_layers, n_users=n_users,
                                  adj_resident=True, tile=128)
    jax.block_until_ready((u2, i2))
    check(u2, i2, "resident/tile128")

    # 3) HBM-streamed adjacency fallback path (exercises the k-accumulation).
    u3, i3 = lgcn_encoder_forward(norm_adj, user_emb, item_emb,
                                  n_layers=n_layers, n_users=n_users,
                                  adj_resident=False, tile=128)
    jax.block_until_ready((u3, i3))
    check(u3, i3, "streamed/tile128")

    print("KERNEL_OK")
</pallas_src>

<mosaic_0001>
module attributes {stable_mosaic.version = 11 : i64} {
  func.func @_lgcn_fused_kernel(%arg0: i32, %arg1: i32, %arg2: i32, %arg3: memref<256x128xf32, #tpu.memory_space<any>>, %arg4: memref<256x256xbf16, #tpu.memory_space<any>>, %arg5: memref<256x128xf32, #tpu.memory_space<vmem>>, %arg6: memref<256x256xbf16, #tpu.memory_space<vmem>>, %arg7: memref<256x128xbf16, #tpu.memory_space<vmem>>, %arg8: memref<256x128xbf16, #tpu.memory_space<vmem>>, %arg9: memref<256x128xf32, #tpu.memory_space<vmem>>) attributes {dimension_semantics = [#tpu.dimension_semantics<arbitrary>, #tpu.dimension_semantics<arbitrary>, #tpu.dimension_semantics<arbitrary>], iteration_bounds = array<i64: 3, 1, 1>, scalar_prefetch = 0 : i64, scratch_operands = 4 : i64, tpu.core_type = #tpu.core_type<tc>, window_params = [{}, {}, {pipeline_mode = #tpu.pipeline_mode<synchronous>, transform_indices = @transform_2, window_bounds = array<i64: 256, 128>}]} {
    %c0_i32 = arith.constant 0 : i32
    %0 = arith.cmpi eq, %arg0, %c0_i32 : i32
    %c0_i32_0 = arith.constant 0 : i32
    %1 = arith.cmpi eq, %arg1, %c0_i32_0 : i32
    %2 = arith.andi %0, %1 : i1
    %c0_i32_1 = arith.constant 0 : i32
    %3 = arith.cmpi eq, %arg2, %c0_i32_1 : i32
    %4 = arith.andi %2, %3 : i1
    %5 = arith.extui %4 : i1 to i32
    %c0_i32_2 = arith.constant 0 : i32
    %6 = arith.cmpi ne, %5, %c0_i32_2 : i32
    scf.if %6 {
      "tpu.region"() ({
        %48 = tpu.sem_alloc : memref<!tpu.dma_semaphore, #tpu.memory_space<semaphore_mem>>
        tpu.enqueue_dma source(%arg3 : memref<256x128xf32, #tpu.memory_space<any>>) target(%arg5 : memref<256x128xf32, #tpu.memory_space<vmem>>) target_semaphore(%48 : memref<!tpu.dma_semaphore, #tpu.memory_space<semaphore_mem>>)
        tpu.wait_dma2 semaphore(%48 : memref<!tpu.dma_semaphore, #tpu.memory_space<semaphore_mem>>) src(%arg3 : memref<256x128xf32, #tpu.memory_space<any>>) dst(%arg5 : memref<256x128xf32, #tpu.memory_space<vmem>>)
        tpu.yield
      }) : () -> ()
      %c0_22 = arith.constant 0 : index
      %c0_23 = arith.constant 0 : index
      %45 = vector.load %arg5[%c0_22, %c0_23] : memref<256x128xf32, #tpu.memory_space<vmem>>, vector<256x128xf32>
      %46 = arith.truncf %45 : vector<256x128xf32> to vector<256x128xbf16>
      %c0_24 = arith.constant 0 : index
      %c0_25 = arith.constant 0 : index
      %47 = vector.load %arg8[%c0_24, %c0_25] : memref<256x128xbf16, #tpu.memory_space<vmem>>, vector<256x128xbf16>
      tpu.vector_store %arg8[%c0_24, %c0_25], %46 {strides = array<i32>} : memref<256x128xbf16, #tpu.memory_space<vmem>>, vector<256x128xbf16>,
      "tpu.region"() ({
        %48 = tpu.sem_alloc : memref<!tpu.dma_semaphore, #tpu.memory_space<semaphore_mem>>
        tpu.enqueue_dma source(%arg4 : memref<256x256xbf16, #tpu.memory_space<any>>) target(%arg6 : memref<256x256xbf16, #tpu.memory_space<vmem>>) target_semaphore(%48 : memref<!tpu.dma_semaphore, #tpu.memory_space<semaphore_mem>>)
        tpu.wait_dma2 semaphore(%48 : memref<!tpu.dma_semaphore, #tpu.memory_space<semaphore_mem>>) src(%arg4 : memref<256x256xbf16, #tpu.memory_space<any>>) dst(%arg6 : memref<256x256xbf16, #tpu.memory_space<vmem>>)
        tpu.yield
      }) : () -> ()
    } else {
    }
    %c256_i32 = arith.constant 256 : i32
    %7 = arith.muli %arg1, %c256_i32 : i32
    %8 = tpu.assume_multiple %7, 256 : i32
    %c256_i32_3 = arith.constant 256 : i32
    %9 = arith.muli %arg2, %c256_i32_3 : i32
    %10 = tpu.assume_multiple %9, 256 : i32
    %c0_i32_4 = arith.constant 0 : i32
    %11 = arith.cmpi eq, %arg2, %c0_i32_4 : i32
    %c0_i32_5 = arith.constant 0 : i32
    %12 = arith.cmpi eq, %arg2, %c0_i32_5 : i32
    %13 = arith.index_cast %8 : i32 to index
    %c0 = arith.constant 0 : index
    %14 = vector.load %arg6[%13, %c0] : memref<256x256xbf16, #tpu.memory_space<vmem>>, vector<256x256xbf16>
    %c2_i32 = arith.constant 2 : i32
    %c0_i32_6 = arith.constant 0 : i32
    %15 = arith.cmpi eq, %c2_i32, %c0_i32_6 : i32
    %c1_i32 = arith.constant 1 : i32
    %16 = arith.select %15, %c1_i32, %c2_i32 : i32
    %17 = arith.remsi %arg0, %16 : i32
    %c0_i32_7 = arith.constant 0 : i32
    %18 = arith.cmpi ne, %17, %c0_i32_7 : i32
    %c0_i32_8 = arith.constant 0 : i32
    %19 = arith.cmpi slt, %17, %c0_i32_8 : i32
    %c0_i32_9 = arith.constant 0 : i32
    %20 = arith.cmpi slt, %16, %c0_i32_9 : i32
    %21 = arith.xori %19, %20 : i1
    %22 = arith.andi %21, %18 : i1
    %23 = arith.addi %17, %16 : i32
    %24 = arith.select %22, %23, %17 : i32
    %c0_i32_10 = arith.constant 0 : i32
    %25 = arith.cmpi eq, %24, %c0_i32_10 : i32
    %26 = arith.extui %25 : i1 to i32
    %c0_i32_11 = arith.constant 0 : i32
    %27 = arith.cmpi ne, %26, %c0_i32_11 : i32
    scf.if %27 {
      %45 = arith.index_cast %10 : i32 to index
      %c0_22 = arith.constant 0 : index
      %46 = vector.load %arg8[%45, %c0_22] : memref<256x128xbf16, #tpu.memory_space<vmem>>, vector<256x128xbf16>
      %cst = arith.constant dense<0.000000e+00> : vector<256x128xf32>
      %47 = tpu.matmul %14, %46, %cst {dimension_numbers = #tpu.dot_dimension_numbers<[1], [0], [0], [1], [0, 0, 1, 1], [], []>} : vector<256x256xbf16>, vector<256x128xbf16>, vector<256x128xf32> -> vector<256x128xf32>
      %48 = arith.extui %11 : i1 to i32
      %c0_i32_23 = arith.constant 0 : i32
      %49 = arith.cmpi ne, %48, %c0_i32_23 : i32
      scf.if %49 {
        %c0_27 = arith.constant 0 : index
        %c0_28 = arith.constant 0 : index
        %55 = vector.load %arg9[%c0_27, %c0_28] : memref<256x128xf32, #tpu.memory_space<vmem>>, vector<256x128xf32>
        tpu.vector_store %arg9[%c0_27, %c0_28], %47 {strides = array<i32>} : memref<256x128xf32, #tpu.memory_space<vmem>>, vector<256x128xf32>,
      } else {
      }
      %c0_i32_24 = arith.constant 0 : i32
      %50 = arith.cmpi sgt, %arg2, %c0_i32_24 : i32
      %51 = arith.extui %50 : i1 to i32
      %c0_i32_25 = arith.constant 0 : i32
      %52 = arith.cmpi ne, %51, %c0_i32_25 : i32
      scf.if %52 {
        %c0_27 = arith.constant 0 : index
        %c0_28 = arith.constant 0 : index
        %55 = vector.load %arg9[%c0_27, %c0_28] : memref<256x128xf32, #tpu.memory_space<vmem>>, vector<256x128xf32>
        %56 = arith.addf %55, %47 : vector<256x128xf32>
        %c0_29 = arith.constant 0 : index
        %c0_30 = arith.constant 0 : index
        %57 = vector.load %arg9[%c0_29, %c0_30] : memref<256x128xf32, #tpu.memory_space<vmem>>, vector<256x128xf32>
        tpu.vector_store %arg9[%c0_29, %c0_30], %56 {strides = array<i32>} : memref<256x128xf32, #tpu.memory_space<vmem>>, vector<256x128xf32>,
      } else {
      }
      %53 = arith.extui %12 : i1 to i32
      %c0_i32_26 = arith.constant 0 : i32
      %54 = arith.cmpi ne, %53, %c0_i32_26 : i32
      scf.if %54 {
        %c0_27 = arith.constant 0 : index
        %c0_28 = arith.constant 0 : index
        %55 = vector.load %arg9[%c0_27, %c0_28] : memref<256x128xf32, #tpu.memory_space<vmem>>, vector<256x128xf32>
        %56 = arith.truncf %55 : vector<256x128xf32> to vector<256x128xbf16>
        %57 = arith.index_cast %8 : i32 to index
        %c0_29 = arith.constant 0 : index
        %58 = vector.load %arg7[%57, %c0_29] : memref<256x128xbf16, #tpu.memory_space<vmem>>, vector<256x128xbf16>
        tpu.vector_store %arg7[%57, %c0_29], %56 {strides = array<i32>} : memref<256x128xbf16, #tpu.memory_space<vmem>>, vector<256x128xbf16>,
        %59 = arith.index_cast %8 : i32 to index
        %c0_30 = arith.constant 0 : index
        %60 = vector.load %arg5[%59, %c0_30] : memref<256x128xf32, #tpu.memory_space<vmem>>, vector<256x128xf32>
        %61 = arith.addf %60, %55 : vector<256x128xf32>
        %62 = arith.index_cast %8 : i32 to index
        %c0_31 = arith.constant 0 : index
        %63 = vector.load %arg5[%62, %c0_31] : memref<256x128xf32, #tpu.memory_space<vmem>>, vector<256x128xf32>
        tpu.vector_store %arg5[%62, %c0_31], %61 {strides = array<i32>} : memref<256x128xf32, #tpu.memory_space<vmem>>, vector<256x128xf32>,
      } else {
      }
    } else {
    }
    %c2_i32_12 = arith.constant 2 : i32
    %c0_i32_13 = arith.constant 0 : i32
    %28 = arith.cmpi eq, %c2_i32_12, %c0_i32_13 : i32
    %c1_i32_14 = arith.constant 1 : i32
    %29 = arith.select %28, %c1_i32_14, %c2_i32_12 : i32
    %30 = arith.remsi %arg0, %29 : i32
    %c0_i32_15 = arith.constant 0 : i32
    %31 = arith.cmpi ne, %30, %c0_i32_15 : i32
    %c0_i32_16 = arith.constant 0 : i32
    %32 = arith.cmpi slt, %30, %c0_i32_16 : i32
    %c0_i32_17 = arith.constant 0 : i32
    %33 = arith.cmpi slt, %29, %c0_i32_17 : i32
    %34 = arith.xori %32, %33 : i1
    %35 = arith.andi %34, %31 : i1
    %36 = arith.addi %30, %29 : i32
    %37 = arith.select %35, %36, %30 : i32
    %c1_i32_18 = arith.constant 1 : i32
    %38 = arith.cmpi eq, %37, %c1_i32_18 : i32
    %39 = arith.extui %38 : i1 to i32
    %c0_i32_19 = arith.constant 0 : i32
    %40 = arith.cmpi ne, %39, %c0_i32_19 : i32
    scf.if %40 {
      %45 = arith.index_cast %10 : i32 to index
      %c0_22 = arith.constant 0 : index
      %46 = vector.load %arg7[%45, %c0_22] : memref<256x128xbf16, #tpu.memory_space<vmem>>, vector<256x128xbf16>
      %cst = arith.constant dense<0.000000e+00> : vector<256x128xf32>
      %47 = tpu.matmul %14, %46, %cst {dimension_numbers = #tpu.dot_dimension_numbers<[1], [0], [0], [1], [0, 0, 1, 1], [], []>} : vector<256x256xbf16>, vector<256x128xbf16>, vector<256x128xf32> -> vector<256x128xf32>
      %48 = arith.extui %11 : i1 to i32
      %c0_i32_23 = arith.constant 0 : i32
      %49 = arith.cmpi ne, %48, %c0_i32_23 : i32
      scf.if %49 {
        %c0_27 = arith.constant 0 : index
        %c0_28 = arith.constant 0 : index
        %55 = vector.load %arg9[%c0_27, %c0_28] : memref<256x128xf32, #tpu.memory_space<vmem>>, vector<256x128xf32>
        tpu.vector_store %arg9[%c0_27, %c0_28], %47 {strides = array<i32>} : memref<256x128xf32, #tpu.memory_space<vmem>>, vector<256x128xf32>,
      } else {
      }
      %c0_i32_24 = arith.constant 0 : i32
      %50 = arith.cmpi sgt, %arg2, %c0_i32_24 : i32
      %51 = arith.extui %50 : i1 to i32
      %c0_i32_25 = arith.constant 0 : i32
      %52 = arith.cmpi ne, %51, %c0_i32_25 : i32
      scf.if %52 {
        %c0_27 = arith.constant 0 : index
        %c0_28 = arith.constant 0 : index
        %55 = vector.load %arg9[%c0_27, %c0_28] : memref<256x128xf32, #tpu.memory_space<vmem>>, vector<256x128xf32>
        %56 = arith.addf %55, %47 : vector<256x128xf32>
        %c0_29 = arith.constant 0 : index
        %c0_30 = arith.constant 0 : index
        %57 = vector.load %arg9[%c0_29, %c0_30] : memref<256x128xf32, #tpu.memory_space<vmem>>, vector<256x128xf32>
        tpu.vector_store %arg9[%c0_29, %c0_30], %56 {strides = array<i32>} : memref<256x128xf32, #tpu.memory_space<vmem>>, vector<256x128xf32>,
      } else {
      }
      %53 = arith.extui %12 : i1 to i32
      %c0_i32_26 = arith.constant 0 : i32
      %54 = arith.cmpi ne, %53, %c0_i32_26 : i32
      scf.if %54 {
        %c0_27 = arith.constant 0 : index
        %c0_28 = arith.constant 0 : index
        %55 = vector.load %arg9[%c0_27, %c0_28] : memref<256x128xf32, #tpu.memory_space<vmem>>, vector<256x128xf32>
        %56 = arith.truncf %55 : vector<256x128xf32> to vector<256x128xbf16>
        %57 = arith.index_cast %8 : i32 to index
        %c0_29 = arith.constant 0 : index
        %58 = vector.load %arg8[%57, %c0_29] : memref<256x128xbf16, #tpu.memory_space<vmem>>, vector<256x128xbf16>
        tpu.vector_store %arg8[%57, %c0_29], %56 {strides = array<i32>} : memref<256x128xbf16, #tpu.memory_space<vmem>>, vector<256x128xbf16>,
        %59 = arith.index_cast %8 : i32 to index
        %c0_30 = arith.constant 0 : index
        %60 = vector.load %arg5[%59, %c0_30] : memref<256x128xf32, #tpu.memory_space<vmem>>, vector<256x128xf32>
        %61 = arith.addf %60, %55 : vector<256x128xf32>
        %62 = arith.index_cast %8 : i32 to index
        %c0_31 = arith.constant 0 : index
        %63 = vector.load %arg5[%62, %c0_31] : memref<256x128xf32, #tpu.memory_space<vmem>>, vector<256x128xf32>
        tpu.vector_store %arg5[%62, %c0_31], %61 {strides = array<i32>} : memref<256x128xf32, #tpu.memory_space<vmem>>, vector<256x128xf32>,
      } else {
      }
    } else {
    }
    %c2_i32_20 = arith.constant 2 : i32
    %41 = arith.cmpi eq, %arg0, %c2_i32_20 : i32
    %42 = arith.andi %41, %12 : i1
    %43 = arith.extui %42 : i1 to i32
    %c0_i32_21 = arith.constant 0 : i32
    %44 = arith.cmpi ne, %43, %c0_i32_21 : i32
    scf.if %44 {
      %45 = arith.index_cast %8 : i32 to index
      %c0_22 = arith.constant 0 : index
      %46 = vector.load %arg5[%45, %c0_22] : memref<256x128xf32, #tpu.memory_space<vmem>>, vector<256x128xf32>
      %cst = arith.constant 2.500000e-01 : f32
      %47 = vector.broadcast %cst : f32 to vector<256x128xf32>
      %48 = arith.mulf %46, %47 : vector<256x128xf32>
      %49 = arith.index_cast %8 : i32 to index
      %c0_23 = arith.constant 0 : index
      %50 = vector.load %arg5[%49, %c0_23] : memref<256x128xf32, #tpu.memory_space<vmem>>, vector<256x128xf32>
      tpu.vector_store %arg5[%49, %c0_23], %48 {strides = array<i32>} : memref<256x128xf32, #tpu.memory_space<vmem>>, vector<256x128xf32>,
    } else {
    }
    return
  }
  func.func @transform_2(%arg0: i32, %arg1: i32, %arg2: i32) -> (i32, i32) {
    %c0_i32 = arith.constant 0 : i32
    %c0_i32_0 = arith.constant 0 : i32
    %c0_i32_1 = arith.constant 0 : i32
    return %c0_i32, %c0_i32_0 : i32, i32
  }
}

</mosaic_0001>

<bundles_post_ra>
// kernel: lgcn_encoder_forward.1
= control target key start
LH: loop header
LB: loop body
LE: loop exit
PB: predicated region body
PF: predicated region fallthrough
CT: control target
= control target key end

     0   :  { %s2043_s9 = smov 0   ;;  %s2045_s10 = smov 0   ;;  %s3210_s0 = inlined_call_operand.vmem [shape: f32[256,128], index: 0, kind: input, shape index: {}]   ;;  %s3211_s1 = inlined_call_operand.vmem [shape: bf16[256,256], index: 1, kind: input, shape index: {}]   ;;  %s3212_s2 = inlined_call_operand.vmem [shape: f32[256,128], index: 2, kind: output, shape index: {}]  }
   0x1 LB: > { %s27_s11 = sadd.s32 1, %s2022_s9  ;;  %p1722_p1 = scmp.ge.s32.totalorder %s2026_s10, 3  ;;  %s2026_s10 = sphi %s2045_s10, %s12_s10   ;;  %s2022_s9 = sphi %s2043_s9, %s3213_s9  }
   0x2   : > { %p29_p0 = scmp.ge.s32.totalorder %s27_s11, 3  ;;  %p52_p2 = scmp.eq.s32.totalorder (!%p1722_p1), %s2022_s9, 0 }
   0x3   : > { %48 = sbr.rel (%p1722_p1) target bundleno = 734 (0x2de), region = 12 }
   0x4   : > { %s3215_s11 = smov (%p29_p0, %s27_s11), 0 }
   0xa   : > { %60 = sbr.rel (!%p52_p2) target bundleno = 83 (0x53), region = 16 }
  0x11   : > { %v93_v0 = vld [vmem:[%s3210_s0] sm:$0xff]  ;;  %v95_v1 = vld [vmem:[%s3210_s0 + $0x8] sm:$0xff]  ;;  %v97_v2 = vld [vmem:[%s3210_s0 + $0x10] sm:$0xff] }
  0x12   : > { %94 = vst [vmem:[%s3212_s2] sm:$0xff] %v93_v0  ;;  %96 = vst [vmem:[%s3212_s2 + $0x8] sm:$0xff] %v95_v1  ;;  %v99_v3 = vld [vmem:[%s3210_s0 + $0x18] sm:$0xff]  ;;  %v101_v4 = vld [vmem:[%s3210_s0 + $0x20] sm:$0xff] }
  0x13   : > { %98 = vst [vmem:[%s3212_s2 + $0x10] sm:$0xff] %v97_v2  ;;  %v103_v5 = vld [vmem:[%s3210_s0 + $0x28] sm:$0xff]  ;;  %100 = vst [vmem:[%s3212_s2 + $0x18] sm:$0xff] %v99_v3  ;;  %v105_v6 = vld [vmem:[%s3210_s0 + $0x30] sm:$0xff] }
  0x14   : > { %102 = vst [vmem:[%s3212_s2 + $0x20] sm:$0xff] %v101_v4  ;;  %104 = vst [vmem:[%s3212_s2 + $0x28] sm:$0xff] %v103_v5  ;;  %v107_v7 = vld [vmem:[%s3210_s0 + $0x38] sm:$0xff]  ;;  %v109_v8 = vld [vmem:[%s3210_s0 + $0x40] sm:$0xff] }
  0x15   : > { %106 = vst [vmem:[%s3212_s2 + $0x30] sm:$0xff] %v105_v6  ;;  %108 = vst [vmem:[%s3212_s2 + $0x38] sm:$0xff] %v107_v7  ;;  %v111_v9 = vld [vmem:[%s3210_s0 + $0x48] sm:$0xff]  ;;  %v113_v10 = vld [vmem:[%s3210_s0 + $0x50] sm:$0xff] }
  0x16   : > { %110 = vst [vmem:[%s3212_s2 + $0x40] sm:$0xff] %v109_v8  ;;  %v115_v11 = vld [vmem:[%s3210_s0 + $0x58] sm:$0xff]  ;;  %112 = vst [vmem:[%s3212_s2 + $0x48] sm:$0xff] %v111_v9  ;;  %v117_v12 = vld [vmem:[%s3210_s0 + $0x60] sm:$0xff] }
  0x17   : > { %114 = vst [vmem:[%s3212_s2 + $0x50] sm:$0xff] %v113_v10  ;;  %116 = vst [vmem:[%s3212_s2 + $0x58] sm:$0xff] %v115_v11  ;;  %v119_v13 = vld [vmem:[%s3210_s0 + $0x68] sm:$0xff]  ;;  %v121_v14 = vld [vmem:[%s3210_s0 + $0x70] sm:$0xff] }
  0x18   : > { %118 = vst [vmem:[%s3212_s2 + $0x60] sm:$0xff] %v117_v12  ;;  %120 = vst [vmem:[%s3212_s2 + $0x68] sm:$0xff] %v119_v13  ;;  %v123_v15 = vld [vmem:[%s3210_s0 + $0x78] sm:$0xff]  ;;  %v125_v16 = vld [vmem:[%s3210_s0 + $0x80] sm:$0xff] }
  0x19   : > { %122 = vst [vmem:[%s3212_s2 + $0x70] sm:$0xff] %v121_v14  ;;  %v127_v17 = vld [vmem:[%s3210_s0 + $0x88] sm:$0xff]  ;;  %124 = vst [vmem:[%s3212_s2 + $0x78] sm:$0xff] %v123_v15  ;;  %v129_v18 = vld [vmem:[%s3210_s0 + $0x90] sm:$0xff] }
  0x1a   : > { %126 = vst [vmem:[%s3212_s2 + $0x80] sm:$0xff] %v125_v16  ;;  %128 = vst [vmem:[%s3212_s2 + $0x88] sm:$0xff] %v127_v17  ;;  %v131_v19 = vld [vmem:[%s3210_s0 + $0x98] sm:$0xff]  ;;  %v133_v20 = vld [vmem:[%s3210_s0 + $0xa0] sm:$0xff] }
  0x1b   : > { %130 = vst [vmem:[%s3212_s2 + $0x90] sm:$0xff] %v129_v18  ;;  %132 = vst [vmem:[%s3212_s2 + $0x98] sm:$0xff] %v131_v19  ;;  %v135_v21 = vld [vmem:[%s3210_s0 + $0xa8] sm:$0xff]  ;;  %v137_v22 = vld [vmem:[%s3210_s0 + $0xb0] sm:$0xff] }
  0x1c   : > { %134 = vst [vmem:[%s3212_s2 + $0xa0] sm:$0xff] %v133_v20  ;;  %v139_v23 = vld [vmem:[%s3210_s0 + $0xb8] sm:$0xff]  ;;  %136 = vst [vmem:[%s3212_s2 + $0xa8] sm:$0xff] %v135_v21  ;;  %v141_v24 = vld [vmem:[%s3210_s0 + $0xc0] sm:$0xff] }
  0x1d   : > { %138 = vst [vmem:[%s3212_s2 + $0xb0] sm:$0xff] %v137_v22  ;;  %140 = vst [vmem:[%s3212_s2 + $0xb8] sm:$0xff] %v139_v23  ;;  %v143_v25 = vld [vmem:[%s3210_s0 + $0xc8] sm:$0xff]  ;;  %v145_v26 = vld [vmem:[%s3210_s0 + $0xd0] sm:$0xff] }
  0x1e   : > { %142 = vst [vmem:[%s3212_s2 + $0xc0] sm:$0xff] %v141_v24  ;;  %144 = vst [vmem:[%s3212_s2 + $0xc8] sm:$0xff] %v143_v25  ;;  %v147_v27 = vld [vmem:[%s3210_s0 + $0xd8] sm:$0xff]  ;;  %v149_v28 = vld [vmem:[%s3210_s0 + $0xe0] sm:$0xff] }
  0x1f   : > { %146 = vst [vmem:[%s3212_s2 + $0xd0] sm:$0xff] %v145_v26  ;;  %v151_v29 = vld [vmem:[%s3210_s0 + $0xe8] sm:$0xff]  ;;  %148 = vst [vmem:[%s3212_s2 + $0xd8] sm:$0xff] %v147_v27  ;;  %v153_v30 = vld [vmem:[%s3210_s0 + $0xf0] sm:$0xff] }
  0x20   : > { %150 = vst [vmem:[%s3212_s2 + $0xe0] sm:$0xff] %v149_v28  ;;  %152 = vst [vmem:[%s3212_s2 + $0xe8] sm:$0xff] %v151_v29  ;;  %v155_v31 = vld [vmem:[%s3210_s0 + $0xf8] sm:$0xff] }
  0x21   : > { %154 = vst [vmem:[%s3212_s2 + $0xf0] sm:$0xff] %v153_v30  ;;  %156 = vst [vmem:[%s3212_s2 + $0xf8] sm:$0xff] %v155_v31 }
  0x22   : > { %164 = vsyncadd [#allocation6], 4096 }
  0x23   : > { %2016 = dma.done.wait [#allocation6], 4096 }
  0x24   : > { %2017 = vsyncadd [#allocation6], 4294963200  ;;  %v168_v32 = vld [vmem:[%s3212_s2] sm:$0xff]  ;;  %v169_v33 = vld [vmem:[%s3212_s2 + $0x8] sm:$0xff] }
  0x25   : > { %v170_v34 = vld [vmem:[%s3212_s2 + $0x10] sm:$0xff]  ;;  %v200_v35 = vpack.c.bf16 %v169_v33, %v168_v32  ;;  %v171_v36 = vld [vmem:[%s3212_s2 + $0x18] sm:$0xff]  ;;  %v172_v37 = vld [vmem:[%s3212_s2 + $0x20] sm:$0xff] }
  0x26   : > { %v173_v38 = vld [vmem:[%s3212_s2 + $0x28] sm:$0xff]  ;;  %v201_v39 = vpack.c.bf16 %v171_v36, %v170_v34  ;;  %v174_v41 = vld [vmem:[%s3212_s2 + $0x30] sm:$0xff]  ;;  %v175_v42 = vld [vmem:[%s3212_s2 + $0x38] sm:$0xff] }
  0x27   : > { %v202_v40 = vpack.c.bf16 %v173_v38, %v172_v37  ;;  %v176_v43 = vld [vmem:[%s3212_s2 + $0x40] sm:$0xff]  ;;  %216 = vst [vmem:[#allocation4] sm:$0xff] %v200_v35  ;;  %v203_v44 = vpack.c.bf16 %v175_v42, %v174_v41  ;;  %v177_v45 = vld [vmem:[%s3212_s2 + $0x48] sm:$0xff]  ;;  %v178_v46 = vld [vmem:[%s3212_s2 + $0x50] sm:$0xff] }
  0x28   : > { %v179_v47 = vld [vmem:[%s3212_s2 + $0x58] sm:$0xff]  ;;  %217 = vst [vmem:[#allocation4 + $0x8] sm:$0xff] %v201_v39  ;;  %v204_v48 = vpack.c.bf16 %v177_v45, %v176_v43  ;;  %v180_v50 = vld [vmem:[%s3212_s2 + $0x60] sm:$0xff]  ;;  %v181_v51 = vld [vmem:[%s3212_s2 + $0x68] sm:$0xff] }
  0x29   : > { %218 = vst [vmem:[#allocation4 + $0x10] sm:$0xff] %v202_v40  ;;  %v205_v49 = vpack.c.bf16 %v179_v47, %v178_v46  ;;  %v182_v52 = vld [vmem:[%s3212_s2 + $0x70] sm:$0xff]  ;;  %219 = vst [vmem:[#allocation4 + $0x18] sm:$0xff] %v203_v44  ;;  %v206_v53 = vpack.c.bf16 %v181_v51, %v180_v50  ;;  %v183_v54 = vld [vmem:[%s3212_s2 + $0x78] sm:$0xff] }
  0x2a   : > { %v184_v55 = vld [vmem:[%s3212_s2 + $0x80] sm:$0xff]  ;;  %v185_v56 = vld [vmem:[%s3212_s2 + $0x88] sm:$0xff]  ;;  %220 = vst [vmem:[#allocation4 + $0x20] sm:$0xff] %v204_v48  ;;  %v207_v57 = vpack.c.bf16 %v183_v54, %v182_v52  ;;  %v186_v59 = vld [vmem:[%s3212_s2 + $0x90] sm:$0xff] }
  0x2b   : > { %221 = vst [vmem:[#allocation4 + $0x28] sm:$0xff] %v205_v49  ;;  %v208_v58 = vpack.c.bf16 %v185_v56, %v184_v55  ;;  %v187_v60 = vld [vmem:[%s3212_s2 + $0x98] sm:$0xff]  ;;  %v188_v61 = vld [vmem:[%s3212_s2 + $0xa0] sm:$0xff]  ;;  %222 = vst [vmem:[#allocation4 + $0x30] sm:$0xff] %v206_v53 }
  0x2c   : > { %v209_v62 = vpack.c.bf16 %v187_v60, %v186_v59  ;;  %v189_v63 = vld [vmem:[%s3212_s2 + $0xa8] sm:$0xff]  ;;  %v190_v0 = vld [vmem:[%s3212_s2 + $0xb0] sm:$0xff]  ;;  %v191_v1 = vld [vmem:[%s3212_s2 + $0xb8] sm:$0xff]  ;;  %223 = vst [vmem:[#allocation4 + $0x38] sm:$0xff] %v207_v57 }
  0x2d   : > { %224 = vst [vmem:[#allocation4 + $0x40] sm:$0xff] %v208_v58  ;;  %v210_v2 = vpack.c.bf16 %v189_v63, %v188_v61  ;;  %v211_v3 = vpack.c.bf16 %v191_v1, %v190_v0  ;;  %v192_v4 = vld [vmem:[%s3212_s2 + $0xc0] sm:$0xff]  ;;  %v193_v5 = vld [vmem:[%s3212_s2 + $0xc8] sm:$0xff]  ;;  %v194_v6 = vld [vmem:[%s3212_s2 + $0xd0] sm:$0xff] }
  0x2e   : > { %225 = vst [vmem:[#allocation4 + $0x48] sm:$0xff] %v209_v62  ;;  %v212_v7 = vpack.c.bf16 %v193_v5, %v192_v4  ;;  %v195_v8 = vld [vmem:[%s3212_s2 + $0xd8] sm:$0xff]  ;;  %v196_v9 = vld [vmem:[%s3212_s2 + $0xe0] sm:$0xff]  ;;  %v197_v10 = vld [vmem:[%s3212_s2 + $0xe8] sm:$0xff] }
  0x2f   : > { %226 = vst [vmem:[#allocation4 + $0x50] sm:$0xff] %v210_v2  ;;  %227 = vst [vmem:[#allocation4 + $0x58] sm:$0xff] %v211_v3  ;;  %v213_v11 = vpack.c.bf16 %v195_v8, %v194_v6  ;;  %v214_v12 = vpack.c.bf16 %v197_v10, %v196_v9  ;;  %v198_v13 = vld [vmem:[%s3212_s2 + $0xf0] sm:$0xff]  ;;  %v199_v14 = vld [vmem:[%s3212_s2 + $0xf8] sm:$0xff] }
  0x30   : > { %228 = vst [vmem:[#allocation4 + $0x60] sm:$0xff] %v212_v7  ;;  %v215_v15 = vpack.c.bf16 %v199_v14, %v198_v13 }
  0x31   : > { %229 = vst [vmem:[#allocation4 + $0x68] sm:$0xff] %v213_v11  ;;  %230 = vst [vmem:[#allocation4 + $0x70] sm:$0xff] %v214_v12 }
  0x32   : > { %231 = vst [vmem:[#allocation4 + $0x78] sm:$0xff] %v215_v15 }
  0x33   : > { %v249_v16 = vld [vmem:[%s3211_s1] sm:$0xf]  ;;  %v251_v17 = vld [vmem:[%s3211_s1 + $0x8] sm:$0xf]  ;;  %v253_v18 = vld [vmem:[%s3211_s1 + $0x4] sm:$0xf] }
  0x34   : > { %250 = vst [vmem:[#allocation2] sm:$0xf] %v249_v16  ;;  %252 = vst [vmem:[#allocation2 + $0x4] sm:$0xf] %v251_v17  ;;  %v255_v19 = vld [vmem:[%s3211_s1 + $0xc] sm:$0xff]   ;;  %v263_v22 = vld [vmem:[%s3211_s1 + $0x1c] sm:$0xff]  }
  0x35   : > { %254 = vst [vmem:[#allocation2 + $0x8] sm:$0xf] %v253_v18  ;;  %v259_v20 = vld [vmem:[%s3211_s1 + $0x18] sm:$0xf]  ;;  %v261_v21 = vld [vmem:[%s3211_s1 + $0x14] sm:$0xf] }
  0x36   : > { %256 = vst [vmem:[#allocation2 + $0xc] sm:$0xff] %v255_v19   ;;  %260 = vst [vmem:[#allocation2 + $0x14] sm:$0xf] %v259_v20  ;;  %v267_v23 = vld [vmem:[%s3211_s1 + $0x28] sm:$0xf]  ;;  %v271_v25 = vld [vmem:[%s3211_s1 + $0x2c] sm:$0xff]  }
  0x37   : > { %262 = vst [vmem:[#allocation2 + $0x18] sm:$0xf] %v261_v21  ;;  %v269_v24 = vld [vmem:[%s3211_s1 + $0x24] sm:$0xf]  ;;  %264 = vst [vmem:[#allocation2 + $0x1c] sm:$0xff] %v263_v22   ;;  %v279_v28 = vld [vmem:[%s3211_s1 + $0x3c] sm:$0xff]  }
  0x38   : > { %268 = vst [vmem:[#allocation2 + $0x24] sm:$0xf] %v267_v23  ;;  %270 = vst [vmem:[#allocation2 + $0x28] sm:$0xf] %v269_v24  ;;  %v275_v26 = vld [vmem:[%s3211_s1 + $0x38] sm:$0xf] }
  0x39   : > { %v277_v27 = vld [vmem:[%s3211_s1 + $0x34] sm:$0xf]  ;;  %272 = vst [vmem:[#allocation2 + $0x2c] sm:$0xff] %v271_v25   ;;  %276 = vst [vmem:[#allocation2 + $0x34] sm:$0xf] %v275_v26  ;;  %v287_v31 = vld [vmem:[%s3211_s1 + $0x4c] sm:$0xff]  }
  0x3a   : > { %278 = vst [vmem:[#allocation2 + $0x38] sm:$0xf] %v277_v27  ;;  %v283_v29 = vld [vmem:[%s3211_s1 + $0x48] sm:$0xf]  ;;  %v285_v30 = vld [vmem:[%s3211_s1 + $0x44] sm:$0xf] }
  0x3b   : > { %280 = vst [vmem:[#allocation2 + $0x3c] sm:$0xff] %v279_v28   ;;  %284 = vst [vmem:[#allocation2 + $0x44] sm:$0xf] %v283_v29  ;;  %v291_v32 = vld [vmem:[%s3211_s1 + $0x58] sm:$0xf]  ;;  %v295_v34 = vld [vmem:[%s3211_s1 + $0x5c] sm:$0xff]  }
  0x3c   : > { %286 = vst [vmem:[#allocation2 + $0x48] sm:$0xf] %v285_v30  ;;  %v293_v33 = vld [vmem:[%s3211_s1 + $0x54] sm:$0xf]  ;;  %288 = vst [vmem:[#allocation2 + $0x4c] sm:$0xff] %v287_v31   ;;  %v303_v37 = vld [vmem:[%s3211_s1 + $0x6c] sm:$0xff]  }
  0x3d   : > { %292 = vst [vmem:[#allocation2 + $0x54] sm:$0xf] %v291_v32  ;;  %294 = vst [vmem:[#allocation2 + $0x58] sm:$0xf] %v293_v33  ;;  %v299_v35 = vld [vmem:[%s3211_s1 + $0x68] sm:$0xf] }
  0x3e   : > { %v301_v36 = vld [vmem:[%s3211_s1 + $0x64] sm:$0xf]  ;;  %296 = vst [vmem:[#allocation2 + $0x5c] sm:$0xff] %v295_v34   ;;  %300 = vst [vmem:[#allocation2 + $0x64] sm:$0xf] %v299_v35  ;;  %v311_v40 = vld [vmem:[%s3211_s1 + $0x7c] sm:$0xff]  }
  0x3f   : > { %302 = vst [vmem:[#allocation2 + $0x68] sm:$0xf] %v301_v36  ;;  %v307_v38 = vld [vmem:[%s3211_s1 + $0x78] sm:$0xf]  ;;  %v309_v39 = vld [vmem:[%s3211_s1 + $0x74] sm:$0xf] }
  0x40   : > { %304 = vst [vmem:[#allocation2 + $0x6c] sm:$0xff] %v303_v37   ;;  %308 = vst [vmem:[#allocation2 + $0x74] sm:$0xf] %v307_v38  ;;  %v315_v41 = vld [vmem:[%s3211_s1 + $0x88] sm:$0xf]  ;;  %v319_v43 = vld [vmem:[%s3211_s1 + $0x8c] sm:$0xff]  }
  0x41   : > { %310 = vst [vmem:[#allocation2 + $0x78] sm:$0xf] %v309_v39  ;;  %v317_v42 = vld [vmem:[%s3211_s1 + $0x84] sm:$0xf]  ;;  %312 = vst [vmem:[#allocation2 + $0x7c] sm:$0xff] %v311_v40   ;;  %v327_v46 = vld [vmem:[%s3211_s1 + $0x9c] sm:$0xff]  }
  0x42   : > { %316 = vst [vmem:[#allocation2 + $0x84] sm:$0xf] %v315_v41  ;;  %318 = vst [vmem:[#allocation2 + $0x88] sm:$0xf] %v317_v42  ;;  %v323_v44 = vld [vmem:[%s3211_s1 + $0x98] sm:$0xf] }
  0x43   : > { %v325_v45 = vld [vmem:[%s3211_s1 + $0x94] sm:$0xf]  ;;  %320 = vst [vmem:[#allocation2 + $0x8c] sm:$0xff] %v319_v43   ;;  %324 = vst [vmem:[#allocation2 + $0x94] sm:$0xf] %v323_v44  ;;  %v335_v49 = vld [vmem:[%s3211_s1 + $0xac] sm:$0xff]  }
  0x44   : > { %326 = vst [vmem:[#allocation2 + $0x98] sm:$0xf] %v325_v45  ;;  %v331_v47 = vld [vmem:[%s3211_s1 + $0xa8] sm:$0xf]  ;;  %v333_v48 = vld [vmem:[%s3211_s1 + $0xa4] sm:$0xf] }
  0x45   : > { %328 = vst [vmem:[#allocation2 + $0x9c] sm:$0xff] %v327_v46   ;;  %332 = vst [vmem:[#allocation2 + $0xa4] sm:$0xf] %v331_v47  ;;  %v339_v50 = vld [vmem:[%s3211_s1 + $0xb8] sm:$0xf]  ;;  %v343_v52 = vld [vmem:[%s3211_s1 + $0xbc] sm:$0xff]  }
  0x46   : > { %334 = vst [vmem:[#allocation2 + $0xa8] sm:$0xf] %v333_v48  ;;  %v341_v51 = vld [vmem:[%s3211_s1 + $0xb4] sm:$0xf]  ;;  %336 = vst [vmem:[#allocation2 + $0xac] sm:$0xff] %v335_v49   ;;  %v351_v55 = vld [vmem:[%s3211_s1 + $0xcc] sm:$0xff]  }
  0x47   : > { %340 = vst [vmem:[#allocation2 + $0xb4] sm:$0xf] %v339_v50  ;;  %342 = vst [vmem:[#allocation2 + $0xb8] sm:$0xf] %v341_v51  ;;  %v347_v53 = vld [vmem:[%s3211_s1 + $0xc8] sm:$0xf] }
  0x48   : > { %v349_v54 = vld [vmem:[%s3211_s1 + $0xc4] sm:$0xf]  ;;  %344 = vst [vmem:[#allocation2 + $0xbc] sm:$0xff] %v343_v52   ;;  %348 = vst [vmem:[#allocation2 + $0xc4] sm:$0xf] %v347_v53  ;;  %v359_v58 = vld [vmem:[%s3211_s1 + $0xdc] sm:$0xff]  }
  0x49   : > { %350 = vst [vmem:[#allocation2 + $0xc8] sm:$0xf] %v349_v54  ;;  %v355_v56 = vld [vmem:[%s3211_s1 + $0xd8] sm:$0xf]  ;;  %v357_v57 = vld [vmem:[%s3211_s1 + $0xd4] sm:$0xf] }
  0x4a   : > { %352 = vst [vmem:[#allocation2 + $0xcc] sm:$0xff] %v351_v55   ;;  %356 = vst [vmem:[#allocation2 + $0xd4] sm:$0xf] %v355_v56  ;;  %v363_v59 = vld [vmem:[%s3211_s1 + $0xe8] sm:$0xf]  ;;  %v367_v61 = vld [vmem:[%s3211_s1 + $0xec] sm:$0xff]  }
  0x4b   : > { %358 = vst [vmem:[#allocation2 + $0xd8] sm:$0xf] %v357_v57  ;;  %v365_v60 = vld [vmem:[%s3211_s1 + $0xe4] sm:$0xf]  ;;  %360 = vst [vmem:[#allocation2 + $0xdc] sm:$0xff] %v359_v58  }
  0x4c   : > { %364 = vst [vmem:[#allocation2 + $0xe4] sm:$0xf] %v363_v59  ;;  %366 = vst [vmem:[#allocation2 + $0xe8] sm:$0xf] %v365_v60  ;;  %v371_v62 = vld [vmem:[%s3211_s1 + $0xf8] sm:$0xf] }
  0x4d   : > { %v373_v63 = vld [vmem:[%s3211_s1 + $0xf4] sm:$0xf]  ;;  %368 = vst [vmem:[#allocation2 + $0xec] sm:$0xff] %v367_v61   ;;  %372 = vst [vmem:[#allocation2 + $0xf4] sm:$0xf] %v371_v62 }
  0x4e   : > { %374 = vst [vmem:[#allocation2 + $0xf8] sm:$0xf] %v373_v63  ;;  %v375_v0 = vld [vmem:[%s3211_s1 + $0xfc] sm:$0xf] }
  0x4f   : > { %376 = vst [vmem:[#allocation2 + $0xfc] sm:$0xf] %v375_v0 }
  0x50   : > { %535 = vsyncadd [#allocation8], 4096 }
  0x51   : > { %2018 = dma.done.wait [#allocation8], 4096 }
  0x52   : > { %2019 = vsyncadd [#allocation8], 4294963200 }
  0x53 PF: > { %v2493_v1 = vld [vmem:[#allocation2] sm:$0xff]  ;;  %v2495_v2 = vld [vmem:[#allocation2 + $0x8] sm:$0xff]  ;;  %v2497_v3 = vld [vmem:[#allocation2 + $0x10] sm:$0xff]  ;;  %s580_s27 = ssub.s32 0, %s2022_s9 }
  0x54   : > { %v2500_v4 = vld [vmem:[#allocation2 + $0x18] sm:$0xff]  ;;  %v2502_v5 = vld [vmem:[#allocation2 + $0x20] sm:$0xff]  ;;  %v2504_v6 = vld [vmem:[#allocation2 + $0x28] sm:$0xff]  ;;  %s1725_s28 = smin.u32 %s2022_s9, %s580_s27 }
  0x55   : > { %v2507_v7 = vld [vmem:[#allocation2 + $0x30] sm:$0xff]  ;;  %v2509_v8 = vld [vmem:[#allocation2 + $0x38] sm:$0xff]  ;;  %v2511_v9 = vld [vmem:[#allocation2 + $0x40] sm:$0xff]  ;;  %s582_s29 = sand.u32 1, %s1725_s28  }
  0x56   : > { %v2513_v10 = vld [vmem:[#allocation2 + $0x48] sm:$0xff]  ;;  %v2515_v11 = vld [vmem:[#allocation2 + $0x50] sm:$0xff]  ;;  %v2517_v12 = vld [vmem:[#allocation2 + $0x58] sm:$0xff]  ;;  %p1727_p3 = scmp.lt.s32.totalorder %s582_s29, 0  ;;  %s589_s30 = sadd.s32 2, %s582_s29 }
  0x57   : > { %v2519_v13 = vld [vmem:[#allocation2 + $0x60] sm:$0xff]  ;;  %v2521_v14 = vld [vmem:[#allocation2 + $0x68] sm:$0xff]  ;;  %v2523_v15 = vld [vmem:[#allocation2 + $0x70] sm:$0xff] }
  0x58   : > { %v2525_v16 = vld [vmem:[#allocation2 + $0x78] sm:$0xff]  ;;  %v2527_v17 = vld [vmem:[#allocation2 + $0x80] sm:$0xff]  ;;  %v2529_v18 = vld [vmem:[#allocation2 + $0x88] sm:$0xff]  ;;  %s3217_s30 = smov (!%p1727_p3, %s589_s30), %s582_s29 }
  0x59   : > { %v2531_v19 = vld [vmem:[#allocation2 + $0x90] sm:$0xff]  ;;  %v2533_v20 = vld [vmem:[#allocation2 + $0x98] sm:$0xff]  ;;  %v2535_v21 = vld [vmem:[#allocation2 + $0xa0] sm:$0xff]  ;;  %p1728_p4 = scmp.ne.s32.totalorder %s3217_s30, 0 }
  0x5a   : > { %v2537_v22 = vld [vmem:[#allocation2 + $0xa8] sm:$0xff]  ;;  %v2539_v23 = vld [vmem:[#allocation2 + $0xb0] sm:$0xff]  ;;  %v2541_v24 = vld [vmem:[#allocation2 + $0xb8] sm:$0xff]  ;;  %647 = vmatprep.mubr.bf16.mxu0 (!%p1728_p4), %v2495_v2  ;;  %711 = vmatprep.mubr.bf16.mxu1 (!%p1728_p4), %v2529_v18 }
  0x5b   : > { %v2543_v25 = vld [vmem:[#allocation2 + $0xc0] sm:$0xff]  ;;  %v2545_v26 = vld [vmem:[#allocation2 + $0xc8] sm:$0xff]  ;;  %v2547_v27 = vld [vmem:[#allocation2 + $0xd0] sm:$0xff]  ;;  %594 = sbr.rel (%p1728_p4) target bundleno = 403 (0x193), region = 93 }
  0x5c   : > { %v2551_v28 = vld [vmem:[#allocation2 + $0xd8] sm:$0xff]  ;;  %v2553_v29 = vld [vmem:[#allocation2 + $0xe0] sm:$0xff]  ;;  %v2555_v30 = vld [vmem:[#allocation2 + $0xe8] sm:$0xff] }
  0x5d   : > { %v2557_v31 = vld [vmem:[#allocation2 + $0xf0] sm:$0xff]  ;;  %v2559_v32 = vld [vmem:[#allocation2 + $0xf8] sm:$0xff]  ;;  %v607_v33 = vld [vmem:[#allocation4 + $0x40] sm:$0xff] (!%p1728_p4) }
  0x5e   : > { %v599_v34 = vld [vmem:[#allocation4] sm:$0xff] (!%p1728_p4)  ;;  %v608_v35 = vld [vmem:[#allocation4 + $0x48] sm:$0xff] (!%p1728_p4)  ;;  %1736 = vmatprep.subr.bf16.mxu0 (!%p1728_p4), %v607_v33  ;;  %1960 = vmatprep.subr.bf16.mxu1 (!%p1728_p4), %v607_v33  ;;  %v609_v37 = vld [vmem:[#allocation4 + $0x50] sm:$0xff] (!%p1728_p4) }
  0x5f   : > { %1737 = vmatpush3.bf16.msra.mxu0 (!%p1728_p4), %v599_v34  ;;  %1968 = vmatpush3.bf16.msra.mxu1 (!%p1728_p4), %v599_v34  ;;  %v600_v36 = vld [vmem:[#allocation4 + $0x8] sm:$0xff] (!%p1728_p4)  ;;  %v601_v38 = vld [vmem:[#allocation4 + $0x10] sm:$0xff] (!%p1728_p4)  ;;  %v610_v39 = vld [vmem:[#allocation4 + $0x58] sm:$0xff] (!%p1728_p4) }
  0x60   : > { %1738 = vmatprep.subr.bf16.mxu0 (!%p1728_p4), %v608_v35  ;;  %1961 = vmatprep.subr.bf16.mxu1 (!%p1728_p4), %v608_v35  ;;  %v602_v40 = vld [vmem:[#allocation4 + $0x18] sm:$0xff] (!%p1728_p4)  ;;  %v611_v41 = vld [vmem:[#allocation4 + $0x60] sm:$0xff] (!%p1728_p4)  ;;  %v612_v43 = vld [vmem:[#allocation4 + $0x68] sm:$0xff] (!%p1728_p4) }
  0x61   : > { %v603_v42 = vld [vmem:[#allocation4 + $0x20] sm:$0xff] (!%p1728_p4)  ;;  %v604_v44 = vld [vmem:[#allocation4 + $0x28] sm:$0xff] (!%p1728_p4)  ;;  %v613_v45 = vld [vmem:[#allocation4 + $0x70] sm:$0xff] (!%p1728_p4) }
  0x62   : > { %v605_v46 = vld [vmem:[#allocation4 + $0x30] sm:$0xff]  ;;  %v614_v47 = vld [vmem:[#allocation4 + $0x78] sm:$0xff]  ;;  %v981_v52 = vld [vmem:[%s3212_s2] sm:$0xff] }
  0x63   : > { %1739 = vmatpush3.bf16.msra.mxu0 %v600_v36  ;;  %1969 = vmatpush3.bf16.msra.mxu1 %v600_v36  ;;  %v606_v48 = vld [vmem:[#allocation4 + $0x38] sm:$0xff]  ;;  %v997_v54 = vld [vmem:[%s3212_s2 + $0x80] sm:$0xff]  ;;  %v982_v60 = vld [vmem:[%s3212_s2 + $0x8] sm:$0xff] }
  0x64   : > { %1740 = vmatprep.subr.bf16.mxu0 %v609_v37  ;;  %1962 = vmatprep.subr.bf16.mxu1 %v609_v37  ;;  %v998_v62 = vld [vmem:[%s3212_s2 + $0x88] sm:$0xff] }
  0x67   : > { %1741 = vmatpush3.bf16.msra.mxu0 %v601_v38  ;;  %1970 = vmatpush3.bf16.msra.mxu1 %v601_v38 }
  0x68   : > { %1742 = vmatprep.subr.bf16.mxu0 %v610_v39  ;;  %1963 = vmatprep.subr.bf16.mxu1 %v610_v39 }
  0x6b   : > { %1743 = vmatpush3.bf16.msra.mxu0 %v602_v40  ;;  %1971 = vmatpush3.bf16.msra.mxu1 %v602_v40 }
  0x6c   : > { %1744 = vmatprep.subr.bf16.mxu0 %v611_v41  ;;  %1964 = vmatprep.subr.bf16.mxu1 %v611_v41 }
  0x6f   : > { %1745 = vmatpush3.bf16.msra.mxu0 %v603_v42  ;;  %1972 = vmatpush3.bf16.msra.mxu1 %v603_v42  ;;  %v983_v42 = vld [vmem:[%s3212_s2 + $0x10] sm:$0xff] }
  0x70   : > { %1746 = vmatprep.subr.bf16.mxu0 %v612_v43  ;;  %1965 = vmatprep.subr.bf16.mxu1 %v612_v43 }
  0x73   : > { %1747 = vmatpush3.bf16.msra.mxu0 %v604_v44  ;;  %1973 = vmatpush3.bf16.msra.mxu1 %v604_v44  ;;  %v999_v44 = vld [vmem:[%s3212_s2 + $0x90] sm:$0xff] }
  0x74   : > { %1748 = vmatprep.subr.bf16.mxu0 %v613_v45  ;;  %1966 = vmatprep.subr.bf16.mxu1 %v613_v45 }
  0x77   : > { %1749 = vmatpush3.bf16.msra.mxu0 %v605_v46  ;;  %1974 = vmatpush3.bf16.msra.mxu1 %v605_v46 }
  0x78   : > { %1750 = vmatprep.subr.bf16.mxu0 %v614_v47  ;;  %1967 = vmatprep.subr.bf16.mxu1 %v614_v47 }
  0x7b   : > { %1751 = vmatpush3.bf16.msra.mxu0 %v606_v48  ;;  %1975 = vmatpush3.bf16.msra.mxu1 %v606_v48 }
  0x7e   : > { %648 = vmatmul.mubr.bf16.vlgmr.msra.gmra.mrb[0].mxu0 %v2493_v1  ;;  %712 = vmatmul.mubr.bf16.vlgmr.msra.gmra.mrb[0].mxu1 %v2527_v17 }
  0x7f   : > { %655 = vmatprep.mubr.bf16.mxu0 %v2500_v4  ;;  %719 = vmatprep.mubr.bf16.mxu1 %v2533_v20 }
  0x86   : > { %656 = vmatmul.mubr.bf16.gmra.mrb[4].mxu0 %v2497_v3  ;;  %720 = vmatmul.mubr.bf16.gmra.mrb[4].mxu1 %v2531_v19 }
  0x87   : > { %663 = vmatprep.mubr.bf16.mxu0 %v2504_v6  ;;  %727 = vmatprep.mubr.bf16.mxu1 %v2537_v22 }
  0x8e   : > { %664 = vmatmul.mubr.bf16.gmra.mrb[8].mxu0 %v2502_v5  ;;  %728 = vmatmul.mubr.bf16.gmra.mrb[8].mxu1 %v2535_v21 }
  0x8f   : > { %671 = vmatprep.mubr.bf16.mxu0 %v2509_v8  ;;  %735 = vmatprep.mubr.bf16.mxu1 %v2541_v24 }
  0x96   : > { %672 = vmatmul.mubr.bf16.gmra.mrb[12].mxu0 %v2507_v7  ;;  %736 = vmatmul.mubr.bf16.gmra.mrb[12].mxu1 %v2539_v23 }
  0x97   : > { %679 = vmatprep.mubr.bf16.mxu0 %v2513_v10  ;;  %743 = vmatprep.mubr.bf16.mxu1 %v2545_v26 }
  0x9e   : > { %680 = vmatmul.mubr.bf16.gmra.mrb[16].mxu0 %v2511_v9  ;;  %744 = vmatmul.mubr.bf16.gmra.mrb[16].mxu1 %v2543_v25 }
  0x9f   : > { %687 = vmatprep.mubr.bf16.mxu0 %v2517_v12  ;;  %751 = vmatprep.mubr.bf16.mxu1 %v2551_v28 }
  0xa6   : > { %688 = vmatmul.mubr.bf16.gmra.mrb[20].mxu0 %v2515_v11  ;;  %752 = vmatmul.mubr.bf16.gmra.mrb[20].mxu1 %v2547_v27 }
  0xa7   : > { %695 = vmatprep.mubr.bf16.mxu0 %v2521_v14  ;;  %759 = vmatprep.mubr.bf16.mxu1 %v2555_v30 }
  0xae   : > { %696 = vmatmul.mubr.bf16.gmra.mrb[24].mxu0 %v2519_v13  ;;  %760 = vmatmul.mubr.bf16.gmra.mrb[24].mxu1 %v2553_v29 }
  0xaf   : > { %703 = vmatprep.mubr.bf16.mxu0 %v2525_v16  ;;  %767 = vmatprep.mubr.bf16.mxu1 %v2559_v32 }
  0xb6   : > { %704 = vmatmul.mubr.bf16.gmra.mrb[28].mxu0 %v2523_v15  ;;  %768 = vmatmul.mubr.bf16.gmra.mrb[28].mxu1 %v2557_v31 }
 0x151   : > { %v1752_v49 = vpop.f32.mrb[0].mxu0  ;;  %v1800_v50 = vpop.f32.mrb[0].mxu1 }
 0x152   : > { %v1753_v51 = vpop.f32.mrb[1].mxu0  ;;  %v1801_v53 = vpop.f32.mrb[1].mxu1 }
 0x153   : > { %v1754_v55 = vadd.f32 %v1753_v51, %v1752_v49  ;;  %v1802_v56 = vadd.f32 %v1801_v53, %v1800_v50  ;;  %v1755_v57 = vpop.f32.mrb[2].mxu0  ;;  %v1803_v58 = vpop.f32.mrb[2].mxu1  ;;  %v984_v50 = vld [vmem:[%s3212_s2 + $0x18] sm:$0xff] }
 0x154   : > { %v1756_v59 = vpop.f32.mrb[3].mxu0  ;;  %v1804_v61 = vpop.f32.mrb[3].mxu1 }
 0x155   : > { %v1013_v63 = vadd.f32 %v1754_v55, %v981_v52  ;;  %v1029_v0 = vadd.f32 %v1802_v56, %v997_v54  ;;  %v1757_v33 = vadd.f32 %v1756_v59, %v1755_v57  ;;  %v1805_v34 = vadd.f32 %v1804_v61, %v1803_v58  ;;  %v1000_v52 = vld [vmem:[%s3212_s2 + $0x98] sm:$0xff] }
 0x157   : > { %1045 = vst [vmem:[%s3212_s2] sm:$0xff] %v1013_v63  ;;  %1061 = vst [vmem:[%s3212_s2 + $0x80] sm:$0xff] %v1029_v0  ;;  %v946_v35 = vpack.c.bf16 %v1757_v33, %v1754_v55  ;;  %v1014_v36 = vadd.f32 %v1757_v33, %v982_v60  ;;  %v954_v37 = vpack.c.bf16 %v1805_v34, %v1802_v56  ;;  %v985_v0 = vld [vmem:[%s3212_s2 + $0x20] sm:$0xff] }
 0x158   : > { %v1030_v38 = vadd.f32 %v1805_v34, %v998_v62  ;;  %v1001_v34 = vld [vmem:[%s3212_s2 + $0xa0] sm:$0xff] }
 0x159   : > { %964 = vst [vmem:[#allocation3] sm:$0xff] %v946_v35  ;;  %1046 = vst [vmem:[%s3212_s2 + $0x8] sm:$0xff] %v1014_v36  ;;  %v1758_v39 = vpop.f32.mrb[4].mxu0  ;;  %v1806_v40 = vpop.f32.mrb[4].mxu1 }
 0x15a   : > { %972 = vst [vmem:[#allocation3 + $0x40] sm:$0xff] %v954_v37  ;;  %1062 = vst [vmem:[%s3212_s2 + $0x88] sm:$0xff] %v1030_v38  ;;  %v1759_v41 = vpop.f32.mrb[5].mxu0  ;;  %v1807_v43 = vpop.f32.mrb[5].mxu1 }
 0x15b   : > { %v1760_v45 = vadd.f32 %v1759_v41, %v1758_v39  ;;  %v1808_v46 = vadd.f32 %v1807_v43, %v1806_v40  ;;  %v1761_v47 = vpop.f32.mrb[6].mxu0  ;;  %v1809_v48 = vpop.f32.mrb[6].mxu1  ;;  %v986_v40 = vld [vmem:[%s3212_s2 + $0x28] sm:$0xff] }
 0x15c   : > { %v1762_v49 = vpop.f32.mrb[7].mxu0  ;;  %v1810_v51 = vpop.f32.mrb[7].mxu1 }
 0x15d   : > { %v1015_v53 = vadd.f32 %v1760_v45, %v983_v42  ;;  %v1031_v54 = vadd.f32 %v1808_v46, %v999_v44  ;;  %v1763_v55 = vadd.f32 %v1762_v49, %v1761_v47  ;;  %v1811_v56 = vadd.f32 %v1810_v51, %v1809_v48  ;;  %v1002_v42 = vld [vmem:[%s3212_s2 + $0xa8] sm:$0xff] }
 0x15f   : > { %1047 = vst [vmem:[%s3212_s2 + $0x10] sm:$0xff] %v1015_v53  ;;  %1063 = vst [vmem:[%s3212_s2 + $0x90] sm:$0xff] %v1031_v54  ;;  %v947_v57 = vpack.c.bf16 %v1763_v55, %v1760_v45  ;;  %v1016_v58 = vadd.f32 %v1763_v55, %v984_v50  ;;  %v955_v59 = vpack.c.bf16 %v1811_v56, %v1808_v46  ;;  %v987_v54 = vld [vmem:[%s3212_s2 + $0x30] sm:$0xff] }
 0x160   : > { %v1032_v60 = vadd.f32 %v1811_v56, %v1000_v52  ;;  %v1003_v56 = vld [vmem:[%s3212_s2 + $0xb0] sm:$0xff] }
 0x161   : > { %965 = vst [vmem:[#allocation3 + $0x8] sm:$0xff] %v947_v57  ;;  %1048 = vst [vmem:[%s3212_s2 + $0x18] sm:$0xff] %v1016_v58  ;;  %v1764_v61 = vpop.f32.mrb[8].mxu0  ;;  %v1812_v62 = vpop.f32.mrb[8].mxu1 }
 0x162   : > { %973 = vst [vmem:[#allocation3 + $0x48] sm:$0xff] %v955_v59  ;;  %1064 = vst [vmem:[%s3212_s2 + $0x98] sm:$0xff] %v1032_v60  ;;  %v1765_v63 = vpop.f32.mrb[9].mxu0  ;;  %v1813_v33 = vpop.f32.mrb[9].mxu1 }
 0x163   : > { %v1766_v35 = vadd.f32 %v1765_v63, %v1764_v61  ;;  %v1814_v36 = vadd.f32 %v1813_v33, %v1812_v62  ;;  %v1767_v37 = vpop.f32.mrb[10].mxu0  ;;  %v1815_v38 = vpop.f32.mrb[10].mxu1  ;;  %v988_v62 = vld [vmem:[%s3212_s2 + $0x38] sm:$0xff] }
 0x164   : > { %v1768_v39 = vpop.f32.mrb[11].mxu0  ;;  %v1816_v41 = vpop.f32.mrb[11].mxu1 }
 0x165   : > { %v1017_v43 = vadd.f32 %v1766_v35, %v985_v0  ;;  %v1033_v44 = vadd.f32 %v1814_v36, %v1001_v34  ;;  %v1769_v45 = vadd.f32 %v1768_v39, %v1767_v37  ;;  %v1817_v46 = vadd.f32 %v1816_v41, %v1815_v38  ;;  %v1004_v0 = vld [vmem:[%s3212_s2 + $0xb8] sm:$0xff] }
 0x167   : > { %1049 = vst [vmem:[%s3212_s2 + $0x20] sm:$0xff] %v1017_v43  ;;  %1065 = vst [vmem:[%s3212_s2 + $0xa0] sm:$0xff] %v1033_v44  ;;  %v948_v47 = vpack.c.bf16 %v1769_v45, %v1766_v35  ;;  %v1018_v48 = vadd.f32 %v1769_v45, %v986_v40  ;;  %v956_v49 = vpack.c.bf16 %v1817_v46, %v1814_v36  ;;  %v989_v44 = vld [vmem:[%s3212_s2 + $0x40] sm:$0xff] }
 0x168   : > { %v1034_v50 = vadd.f32 %v1817_v46, %v1002_v42  ;;  %v1005_v46 = vld [vmem:[%s3212_s2 + $0xc0] sm:$0xff] }
 0x169   : > { %966 = vst [vmem:[#allocation3 + $0x10] sm:$0xff] %v948_v47  ;;  %1050 = vst [vmem:[%s3212_s2 + $0x28] sm:$0xff] %v1018_v48  ;;  %v1770_v51 = vpop.f32.mrb[12].mxu0  ;;  %v1818_v52 = vpop.f32.mrb[12].mxu1 }
 0x16a   : > { %974 = vst [vmem:[#allocation3 + $0x50] sm:$0xff] %v956_v49  ;;  %1066 = vst [vmem:[%s3212_s2 + $0xa8] sm:$0xff] %v1034_v50  ;;  %v1771_v53 = vpop.f32.mrb[13].mxu0  ;;  %v1819_v55 = vpop.f32.mrb[13].mxu1 }
 0x16b   : > { %v1772_v57 = vadd.f32 %v1771_v53, %v1770_v51  ;;  %v1820_v58 = vadd.f32 %v1819_v55, %v1818_v52  ;;  %v1773_v59 = vpop.f32.mrb[14].mxu0  ;;  %v1821_v60 = vpop.f32.mrb[14].mxu1  ;;  %v990_v52 = vld [vmem:[%s3212_s2 + $0x48] sm:$0xff] }
 0x16c   : > { %v1774_v61 = vpop.f32.mrb[15].mxu0  ;;  %v1822_v63 = vpop.f32.mrb[15].mxu1 }
 0x16d   : > { %v1019_v33 = vadd.f32 %v1772_v57, %v987_v54  ;;  %v1035_v34 = vadd.f32 %v1820_v58, %v1003_v56  ;;  %v1775_v35 = vadd.f32 %v1774_v61, %v1773_v59  ;;  %v1823_v36 = vadd.f32 %v1822_v63, %v1821_v60  ;;  %v1006_v54 = vld [vmem:[%s3212_s2 + $0xc8] sm:$0xff] }
 0x16f   : > { %1051 = vst [vmem:[%s3212_s2 + $0x30] sm:$0xff] %v1019_v33  ;;  %1067 = vst [vmem:[%s3212_s2 + $0xb0] sm:$0xff] %v1035_v34  ;;  %v949_v37 = vpack.c.bf16 %v1775_v35, %v1772_v57  ;;  %v1020_v38 = vadd.f32 %v1775_v35, %v988_v62  ;;  %v957_v39 = vpack.c.bf16 %v1823_v36, %v1820_v58  ;;  %v991_v34 = vld [vmem:[%s3212_s2 + $0x50] sm:$0xff] }
 0x170   : > { %v1036_v40 = vadd.f32 %v1823_v36, %v1004_v0  ;;  %v1007_v36 = vld [vmem:[%s3212_s2 + $0xd0] sm:$0xff] }
 0x171   : > { %967 = vst [vmem:[#allocation3 + $0x18] sm:$0xff] %v949_v37  ;;  %1052 = vst [vmem:[%s3212_s2 + $0x38] sm:$0xff] %v1020_v38  ;;  %v1776_v41 = vpop.f32.mrb[16].mxu0  ;;  %v1824_v42 = vpop.f32.mrb[16].mxu1 }
 0x172   : > { %975 = vst [vmem:[#allocation3 + $0x58] sm:$0xff] %v957_v39  ;;  %1068 = vst [vmem:[%s3212_s2 + $0xb8] sm:$0xff] %v1036_v40  ;;  %v1777_v43 = vpop.f32.mrb[17].mxu0  ;;  %v1825_v45 = vpop.f32.mrb[17].mxu1 }
 0x173   : > { %v1778_v47 = vadd.f32 %v1777_v43, %v1776_v41  ;;  %v1826_v48 = vadd.f32 %v1825_v45, %v1824_v42  ;;  %v1779_v49 = vpop.f32.mrb[18].mxu0  ;;  %v1827_v50 = vpop.f32.mrb[18].mxu1  ;;  %v992_v42 = vld [vmem:[%s3212_s2 + $0x58] sm:$0xff] }
 0x174   : > { %v1780_v51 = vpop.f32.mrb[19].mxu0  ;;  %v1828_v53 = vpop.f32.mrb[19].mxu1 }
 0x175   : > { %v1021_v55 = vadd.f32 %v1778_v47, %v989_v44  ;;  %v1037_v56 = vadd.f32 %v1826_v48, %v1005_v46  ;;  %v1781_v57 = vadd.f32 %v1780_v51, %v1779_v49  ;;  %v1829_v58 = vadd.f32 %v1828_v53, %v1827_v50  ;;  %v1008_v44 = vld [vmem:[%s3212_s2 + $0xd8] sm:$0xff] }
 0x177   : > { %1053 = vst [vmem:[%s3212_s2 + $0x40] sm:$0xff] %v1021_v55  ;;  %1069 = vst [vmem:[%s3212_s2 + $0xc0] sm:$0xff] %v1037_v56  ;;  %v950_v59 = vpack.c.bf16 %v1781_v57, %v1778_v47  ;;  %v1022_v60 = vadd.f32 %v1781_v57, %v990_v52  ;;  %v958_v61 = vpack.c.bf16 %v1829_v58, %v1826_v48  ;;  %v993_v56 = vld [vmem:[%s3212_s2 + $0x60] sm:$0xff] }
 0x178   : > { %v1038_v62 = vadd.f32 %v1829_v58, %v1006_v54  ;;  %v1009_v58 = vld [vmem:[%s3212_s2 + $0xe0] sm:$0xff] }
 0x179   : > { %968 = vst [vmem:[#allocation3 + $0x20] sm:$0xff] %v950_v59  ;;  %1054 = vst [vmem:[%s3212_s2 + $0x48] sm:$0xff] %v1022_v60  ;;  %v1782_v63 = vpop.f32.mrb[20].mxu0  ;;  %v1830_v0 = vpop.f32.mrb[20].mxu1 }
 0x17a   : > { %976 = vst [vmem:[#allocation3 + $0x60] sm:$0xff] %v958_v61  ;;  %1070 = vst [vmem:[%s3212_s2 + $0xc8] sm:$0xff] %v1038_v62  ;;  %v1783_v33 = vpop.f32.mrb[21].mxu0  ;;  %v1831_v35 = vpop.f32.mrb[21].mxu1 }
 0x17b   : > { %v1784_v37 = vadd.f32 %v1783_v33, %v1782_v63  ;;  %v1832_v38 = vadd.f32 %v1831_v35, %v1830_v0  ;;  %v1785_v39 = vpop.f32.mrb[22].mxu0  ;;  %v1833_v40 = vpop.f32.mrb[22].mxu1  ;;  %v994_v0 = vld [vmem:[%s3212_s2 + $0x68] sm:$0xff] }
 0x17c   : > { %v1786_v41 = vpop.f32.mrb[23].mxu0  ;;  %v1834_v43 = vpop.f32.mrb[23].mxu1 }
 0x17d   : > { %v1023_v45 = vadd.f32 %v1784_v37, %v991_v34  ;;  %v1039_v46 = vadd.f32 %v1832_v38, %v1007_v36  ;;  %v1787_v47 = vadd.f32 %v1786_v41, %v1785_v39  ;;  %v1835_v48 = vadd.f32 %v1834_v43, %v1833_v40  ;;  %v1010_v34 = vld [vmem:[%s3212_s2 + $0xe8] sm:$0xff] }
 0x17f   : > { %1055 = vst [vmem:[%s3212_s2 + $0x50] sm:$0xff] %v1023_v45  ;;  %1071 = vst [vmem:[%s3212_s2 + $0xd0] sm:$0xff] %v1039_v46  ;;  %v951_v49 = vpack.c.bf16 %v1787_v47, %v1784_v37  ;;  %v1024_v50 = vadd.f32 %v1787_v47, %v992_v42  ;;  %v959_v51 = vpack.c.bf16 %v1835_v48, %v1832_v38  ;;  %v995_v46 = vld [vmem:[%s3212_s2 + $0x70] sm:$0xff] }
 0x180   : > { %v1040_v52 = vadd.f32 %v1835_v48, %v1008_v44  ;;  %v1011_v48 = vld [vmem:[%s3212_s2 + $0xf0] sm:$0xff] }
 0x181   : > { %969 = vst [vmem:[#allocation3 + $0x28] sm:$0xff] %v951_v49  ;;  %1056 = vst [vmem:[%s3212_s2 + $0x58] sm:$0xff] %v1024_v50  ;;  %v1788_v53 = vpop.f32.mrb[24].mxu0  ;;  %v1836_v54 = vpop.f32.mrb[24].mxu1 }
 0x182   : > { %977 = vst [vmem:[#allocation3 + $0x68] sm:$0xff] %v959_v51  ;;  %1072 = vst [vmem:[%s3212_s2 + $0xd8] sm:$0xff] %v1040_v52  ;;  %v1789_v55 = vpop.f32.mrb[25].mxu0  ;;  %v1837_v57 = vpop.f32.mrb[25].mxu1 }
 0x183   : > { %v1790_v59 = vadd.f32 %v1789_v55, %v1788_v53  ;;  %v1838_v60 = vadd.f32 %v1837_v57, %v1836_v54  ;;  %v1791_v61 = vpop.f32.mrb[26].mxu0  ;;  %v1839_v62 = vpop.f32.mrb[26].mxu1  ;;  %v996_v54 = vld [vmem:[%s3212_s2 + $0x78] sm:$0xff] }
 0x184   : > { %v1792_v63 = vpop.f32.mrb[27].mxu0  ;;  %v1840_v33 = vpop.f32.mrb[27].mxu1 }
 0x185   : > { %v1025_v35 = vadd.f32 %v1790_v59, %v993_v56  ;;  %v1041_v36 = vadd.f32 %v1838_v60, %v1009_v58  ;;  %v1793_v37 = vadd.f32 %v1792_v63, %v1791_v61  ;;  %v1841_v38 = vadd.f32 %v1840_v33, %v1839_v62  ;;  %v1012_v56 = vld [vmem:[%s3212_s2 + $0xf8] sm:$0xff] }
 0x187   : > { %1057 = vst [vmem:[%s3212_s2 + $0x60] sm:$0xff] %v1025_v35  ;;  %1073 = vst [vmem:[%s3212_s2 + $0xe0] sm:$0xff] %v1041_v36  ;;  %v952_v39 = vpack.c.bf16 %v1793_v37, %v1790_v59  ;;  %v1026_v40 = vadd.f32 %v1793_v37, %v994_v0  ;;  %v960_v41 = vpack.c.bf16 %v1841_v38, %v1838_v60 }
 0x188   : > { %v1042_v42 = vadd.f32 %v1841_v38, %v1010_v34 }
 0x189   : > { %970 = vst [vmem:[#allocation3 + $0x30] sm:$0xff] %v952_v39  ;;  %1058 = vst [vmem:[%s3212_s2 + $0x68] sm:$0xff] %v1026_v40  ;;  %v1794_v43 = vpop.f32.mrb[28].mxu0  ;;  %v1842_v44 = vpop.f32.mrb[28].mxu1 }
 0x18a   : > { %978 = vst [vmem:[#allocation3 + $0x70] sm:$0xff] %v960_v41  ;;  %1074 = vst [vmem:[%s3212_s2 + $0xe8] sm:$0xff] %v1042_v42  ;;  %v1795_v45 = vpop.f32.mrb[29].mxu0  ;;  %v1843_v47 = vpop.f32.mrb[29].mxu1 }
 0x18b   : > { %v1796_v49 = vadd.f32 %v1795_v45, %v1794_v43  ;;  %v1844_v50 = vadd.f32 %v1843_v47, %v1842_v44  ;;  %v1797_v51 = vpop.f32.mrb[30].mxu0  ;;  %v1845_v52 = vpop.f32.mrb[30].mxu1 }
 0x18c   : > { %v1798_v53 = vpop.f32.mrb[31].mxu0  ;;  %v1846_v55 = vpop.f32.mrb[31].mxu1 }
 0x18d   : > { %v1027_v57 = vadd.f32 %v1796_v49, %v995_v46  ;;  %v1043_v58 = vadd.f32 %v1844_v50, %v1011_v48  ;;  %v1799_v59 = vadd.f32 %v1798_v53, %v1797_v51  ;;  %v1847_v60 = vadd.f32 %v1846_v55, %v1845_v52 }
 0x18f   : > { %1059 = vst [vmem:[%s3212_s2 + $0x70] sm:$0xff] %v1027_v57  ;;  %1075 = vst [vmem:[%s3212_s2 + $0xf0] sm:$0xff] %v1043_v58  ;;  %v953_v61 = vpack.c.bf16 %v1799_v59, %v1796_v49  ;;  %v1028_v62 = vadd.f32 %v1799_v59, %v996_v54  ;;  %v961_v63 = vpack.c.bf16 %v1847_v60, %v1844_v50 }
 0x190   : > { %v1044_v0 = vadd.f32 %v1847_v60, %v1012_v56 }
 0x191   : > { %971 = vst [vmem:[#allocation3 + $0x38] sm:$0xff] %v953_v61  ;;  %1060 = vst [vmem:[%s3212_s2 + $0x78] sm:$0xff] %v1028_v62 }
 0x192   : > { %979 = vst [vmem:[#allocation3 + $0x78] sm:$0xff] %v961_v63  ;;  %1076 = vst [vmem:[%s3212_s2 + $0xf8] sm:$0xff] %v1044_v0 }
 0x193 PF: > { %p1729_p5 = scmp.ne.s32.totalorder %s3217_s30, 1 }
 0x194   : > { %v1093_v33 = vld [vmem:[#allocation3 + $0x40] sm:$0xff] (!%p1729_p5)  ;;  %v1094_v35 = vld [vmem:[#allocation3 + $0x48] sm:$0xff] (!%p1729_p5)  ;;  %1133 = vmatprep.mubr.bf16.mxu0 (!%p1729_p5), %v2495_v2  ;;  %1197 = vmatprep.mubr.bf16.mxu1 (!%p1729_p5), %v2529_v18  ;;  %v1095_v37 = vld [vmem:[#allocation3 + $0x50] sm:$0xff] (!%p1729_p5) }
 0x195   : > { %1080 = sbr.rel (%p1729_p5) target bundleno = 714 (0x2ca), region = 109  ;;  %v1085_v34 = vld [vmem:[#allocation3] sm:$0xff] (!%p1729_p5)  ;;  %1848 = vmatprep.subr.bf16.mxu0 (!%p1729_p5), %v1093_v33  ;;  %1976 = vmatprep.subr.bf16.mxu1 (!%p1729_p5), %v1093_v33  ;;  %v1086_v36 = vld [vmem:[#allocation3 + $0x8] sm:$0xff] (!%p1729_p5)  ;;  %v1087_v38 = vld [vmem:[#allocation3 + $0x10] sm:$0xff] (!%p1729_p5) }
 0x196   : > { %1849 = vmatpush3.bf16.msra.mxu0 (!%p1729_p5), %v1085_v34  ;;  %1984 = vmatpush3.bf16.msra.mxu1 (!%p1729_p5), %v1085_v34  ;;  %v1096_v39 = vld [vmem:[#allocation3 + $0x58] sm:$0xff] (!%p1729_p5)  ;;  %v1097_v18 = vld [vmem:[#allocation3 + $0x60] sm:$0xff] (!%p1729_p5)  ;;  %v1098_v41 = vld [vmem:[#allocation3 + $0x68] sm:$0xff] (!%p1729_p5) }
 0x197   : > { %1850 = vmatprep.subr.bf16.mxu0 (!%p1729_p5), %v1094_v35  ;;  %1977 = vmatprep.subr.bf16.mxu1 (!%p1729_p5), %v1094_v35  ;;  %v1088_v2 = vld [vmem:[#allocation3 + $0x18] sm:$0xff] (!%p1729_p5)  ;;  %v1089_v40 = vld [vmem:[#allocation3 + $0x20] sm:$0xff] (!%p1729_p5)  ;;  %v1090_v42 = vld [vmem:[#allocation3 + $0x28] sm:$0xff] (!%p1729_p5) }
 0x198   : > { %v1099_v43 = vld [vmem:[#allocation3 + $0x70] sm:$0xff] (!%p1729_p5)  ;;  %v1092_v46 = vld [vmem:[#allocation3 + $0x38] sm:$0xff] (!%p1729_p5)  ;;  %v1471_v0 = vld [vmem:[%s3212_s2 + $0x20] sm:$0xff] (!%p1729_p5) }
 0x199   : > { %v1091_v44 = vld [vmem:[#allocation3 + $0x30] sm:$0xff] (!%p1729_p5)  ;;  %v1100_v45 = vld [vmem:[#allocation3 + $0x78] sm:$0xff] (!%p1729_p5)  ;;  %v1487_v34 = vld [vmem:[%s3212_s2 + $0xa0] sm:$0xff] (!%p1729_p5) }
 0x19a   : > { %1851 = vmatpush3.bf16.msra.mxu0 (!%p1729_p5), %v1086_v36  ;;  %1985 = vmatpush3.bf16.msra.mxu1 (!%p1729_p5), %v1086_v36  ;;  %v1470_v50 = vld [vmem:[%s3212_s2 + $0x18] sm:$0xff] (!%p1729_p5) }
 0x19b   : > { %1852 = vmatprep.subr.bf16.mxu0 (!%p1729_p5), %v1095_v37  ;;  %1978 = vmatprep.subr.bf16.mxu1 (!%p1729_p5), %v1095_v37  ;;  %v1486_v52 = vld [vmem:[%s3212_s2 + $0x98] sm:$0xff] (!%p1729_p5) }
 0x19e   : > { %1853 = vmatpush3.bf16.msra.mxu0 %v1087_v38  ;;  %1986 = vmatpush3.bf16.msra.mxu1 %v1087_v38 }
 0x19f   : > { %1854 = vmatprep.subr.bf16.mxu0 %v1096_v39  ;;  %1979 = vmatprep.subr.bf16.mxu1 %v1096_v39 }
 0x1a2   : > { %1855 = vmatpush3.bf16.msra.mxu0 %v1088_v2  ;;  %1987 = vmatpush3.bf16.msra.mxu1 %v1088_v2  ;;  %v1472_v2 = vld [vmem:[%s3212_s2 + $0x28] sm:$0xff] }
 0x1a3   : > { %1856 = vmatprep.subr.bf16.mxu0 %v1097_v18  ;;  %1980 = vmatprep.subr.bf16.mxu1 %v1097_v18 }
 0x1a6   : > { %1857 = vmatpush3.bf16.msra.mxu0 %v1089_v40  ;;  %1988 = vmatpush3.bf16.msra.mxu1 %v1089_v40  ;;  %v1488_v40 = vld [vmem:[%s3212_s2 + $0xa8] sm:$0xff] }
 0x1a7   : > { %1858 = vmatprep.subr.bf16.mxu0 %v1098_v41  ;;  %1981 = vmatprep.subr.bf16.mxu1 %v1098_v41 }
 0x1aa   : > { %1859 = vmatpush3.bf16.msra.mxu0 %v1090_v42  ;;  %1989 = vmatpush3.bf16.msra.mxu1 %v1090_v42 }
 0x1ab   : > { %1860 = vmatprep.subr.bf16.mxu0 %v1099_v43  ;;  %1982 = vmatprep.subr.bf16.mxu1 %v1099_v43 }
 0x1ae   : > { %1861 = vmatpush3.bf16.msra.mxu0 %v1091_v44  ;;  %1990 = vmatpush3.bf16.msra.mxu1 %v1091_v44 }
 0x1af   : > { %1862 = vmatprep.subr.bf16.mxu0 %v1100_v45  ;;  %1983 = vmatprep.subr.bf16.mxu1 %v1100_v45 }
 0x1b2   : > { %1863 = vmatpush3.bf16.msra.mxu0 %v1092_v46  ;;  %1991 = vmatpush3.bf16.msra.mxu1 %v1092_v46 }
 0x1b5   : > { %1134 = vmatmul.mubr.bf16.vlgmr.msra.gmra.mrb[0].mxu0 %v2493_v1  ;;  %1198 = vmatmul.mubr.bf16.vlgmr.msra.gmra.mrb[0].mxu1 %v2527_v17 }
 0x1b6   : > { %1141 = vmatprep.mubr.bf16.mxu0 %v2500_v4  ;;  %1205 = vmatprep.mubr.bf16.mxu1 %v2533_v20 }
 0x1bd   : > { %1142 = vmatmul.mubr.bf16.gmra.mrb[4].mxu0 %v2497_v3  ;;  %1206 = vmatmul.mubr.bf16.gmra.mrb[4].mxu1 %v2531_v19 }
 0x1be   : > { %1149 = vmatprep.mubr.bf16.mxu0 %v2504_v6  ;;  %1213 = vmatprep.mubr.bf16.mxu1 %v2537_v22 }
 0x1c5   : > { %1150 = vmatmul.mubr.bf16.gmra.mrb[8].mxu0 %v2502_v5  ;;  %1214 = vmatmul.mubr.bf16.gmra.mrb[8].mxu1 %v2535_v21  ;;  %v1467_v5 = vld [vmem:[%s3212_s2] sm:$0xff] }
 0x1c6   : > { %1157 = vmatprep.mubr.bf16.mxu0 %v2509_v8  ;;  %1221 = vmatprep.mubr.bf16.mxu1 %v2541_v24 }
 0x1cd   : > { %1158 = vmatmul.mubr.bf16.gmra.mrb[12].mxu0 %v2507_v7  ;;  %1222 = vmatmul.mubr.bf16.gmra.mrb[12].mxu1 %v2539_v23  ;;  %v1483_v7 = vld [vmem:[%s3212_s2 + $0x80] sm:$0xff] }
 0x1ce   : > { %1165 = vmatprep.mubr.bf16.mxu0 %v2513_v10  ;;  %1229 = vmatprep.mubr.bf16.mxu1 %v2545_v26 }
 0x1d5   : > { %1166 = vmatmul.mubr.bf16.gmra.mrb[16].mxu0 %v2511_v9  ;;  %1230 = vmatmul.mubr.bf16.gmra.mrb[16].mxu1 %v2543_v25 }
 0x1d6   : > { %1173 = vmatprep.mubr.bf16.mxu0 %v2517_v12  ;;  %1237 = vmatprep.mubr.bf16.mxu1 %v2551_v28  ;;  %v1469_v28 = vld [vmem:[%s3212_s2 + $0x10] sm:$0xff] }
 0x1dd   : > { %1174 = vmatmul.mubr.bf16.gmra.mrb[20].mxu0 %v2515_v11  ;;  %1238 = vmatmul.mubr.bf16.gmra.mrb[20].mxu1 %v2547_v27 }
 0x1de   : > { %1181 = vmatprep.mubr.bf16.mxu0 %v2521_v14  ;;  %1245 = vmatprep.mubr.bf16.mxu1 %v2555_v30  ;;  %v1485_v30 = vld [vmem:[%s3212_s2 + $0x90] sm:$0xff] }
 0x1e5   : > { %1182 = vmatmul.mubr.bf16.gmra.mrb[24].mxu0 %v2519_v13  ;;  %1246 = vmatmul.mubr.bf16.gmra.mrb[24].mxu1 %v2553_v29  ;;  %v1468_v13 = vld [vmem:[%s3212_s2 + $0x8] sm:$0xff] }
 0x1e6   : > { %1189 = vmatprep.mubr.bf16.mxu0 %v2525_v16  ;;  %1253 = vmatprep.mubr.bf16.mxu1 %v2559_v32 }
 0x1ed   : > { %1190 = vmatmul.mubr.bf16.gmra.mrb[28].mxu0 %v2523_v15  ;;  %1254 = vmatmul.mubr.bf16.gmra.mrb[28].mxu1 %v2557_v31  ;;  %v1484_v15 = vld [vmem:[%s3212_s2 + $0x88] sm:$0xff] }
 0x288   : > { %v1864_v1 = vpop.f32.mrb[0].mxu0  ;;  %v1912_v3 = vpop.f32.mrb[0].mxu1 }
 0x289   : > { %v1865_v4 = vpop.f32.mrb[1].mxu0  ;;  %v1913_v6 = vpop.f32.mrb[1].mxu1 }
 0x28a   : > { %v1866_v8 = vadd.f32 %v1865_v4, %v1864_v1  ;;  %v1914_v9 = vadd.f32 %v1913_v6, %v1912_v3  ;;  %v1867_v10 = vpop.f32.mrb[2].mxu0  ;;  %v1915_v11 = vpop.f32.mrb[2].mxu1 }
 0x28b   : > { %v1868_v12 = vpop.f32.mrb[3].mxu0  ;;  %v1916_v14 = vpop.f32.mrb[3].mxu1 }
 0x28c   : > { %v1499_v16 = vadd.f32 %v1866_v8, %v1467_v5  ;;  %v1515_v17 = vadd.f32 %v1914_v9, %v1483_v7  ;;  %v1869_v19 = vadd.f32 %v1868_v12, %v1867_v10  ;;  %v1917_v20 = vadd.f32 %v1916_v14, %v1915_v11  ;;  %v1473_v7 = vld [vmem:[%s3212_s2 + $0x30] sm:$0xff] }
 0x28e   : > { %1531 = vst [vmem:[%s3212_s2] sm:$0xff] %v1499_v16  ;;  %1547 = vst [vmem:[%s3212_s2 + $0x80] sm:$0xff] %v1515_v17  ;;  %v1432_v21 = vpack.c.bf16 %v1869_v19, %v1866_v8  ;;  %v1500_v22 = vadd.f32 %v1869_v19, %v1468_v13  ;;  %v1440_v23 = vpack.c.bf16 %v1917_v20, %v1914_v9  ;;  %v1489_v9 = vld [vmem:[%s3212_s2 + $0xb0] sm:$0xff]  ;;  %v1490_v17 = vld [vmem:[%s3212_s2 + $0xb8] sm:$0xff] }
 0x28f   : > { %v1516_v24 = vadd.f32 %v1917_v20, %v1484_v15  ;;  %v1474_v15 = vld [vmem:[%s3212_s2 + $0x38] sm:$0xff] }
 0x290   : > { %1450 = vst [vmem:[#allocation4] sm:$0xff] %v1432_v21  ;;  %1532 = vst [vmem:[%s3212_s2 + $0x8] sm:$0xff] %v1500_v22  ;;  %v1870_v25 = vpop.f32.mrb[4].mxu0  ;;  %v1918_v26 = vpop.f32.mrb[4].mxu1 }
 0x291   : > { %1458 = vst [vmem:[#allocation4 + $0x40] sm:$0xff] %v1440_v23  ;;  %1548 = vst [vmem:[%s3212_s2 + $0x88] sm:$0xff] %v1516_v24  ;;  %v1871_v27 = vpop.f32.mrb[5].mxu0  ;;  %v1919_v29 = vpop.f32.mrb[5].mxu1 }
 0x292   : > { %v1872_v31 = vadd.f32 %v1871_v27, %v1870_v25  ;;  %v1920_v32 = vadd.f32 %v1919_v29, %v1918_v26  ;;  %v1873_v47 = vpop.f32.mrb[6].mxu0  ;;  %v1921_v48 = vpop.f32.mrb[6].mxu1 }
 0x293   : > { %v1874_v49 = vpop.f32.mrb[7].mxu0  ;;  %v1922_v51 = vpop.f32.mrb[7].mxu1 }
 0x294   : > { %v1501_v53 = vadd.f32 %v1872_v31, %v1469_v28  ;;  %v1517_v54 = vadd.f32 %v1920_v32, %v1485_v30  ;;  %v1875_v55 = vadd.f32 %v1874_v49, %v1873_v47  ;;  %v1923_v56 = vadd.f32 %v1922_v51, %v1921_v48  ;;  %v1475_v30 = vld [vmem:[%s3212_s2 + $0x40] sm:$0xff] }
 0x296   : > { %1533 = vst [vmem:[%s3212_s2 + $0x10] sm:$0xff] %v1501_v53  ;;  %1549 = vst [vmem:[%s3212_s2 + $0x90] sm:$0xff] %v1517_v54  ;;  %v1433_v57 = vpack.c.bf16 %v1875_v55, %v1872_v31  ;;  %v1502_v58 = vadd.f32 %v1875_v55, %v1470_v50  ;;  %v1441_v59 = vpack.c.bf16 %v1923_v56, %v1920_v32  ;;  %v1491_v32 = vld [vmem:[%s3212_s2 + $0xc0] sm:$0xff]  ;;  %v1492_v54 = vld [vmem:[%s3212_s2 + $0xc8] sm:$0xff] }
 0x297   : > { %v1518_v60 = vadd.f32 %v1923_v56, %v1486_v52  ;;  %v1476_v52 = vld [vmem:[%s3212_s2 + $0x48] sm:$0xff] }
 0x298   : > { %1451 = vst [vmem:[#allocation4 + $0x8] sm:$0xff] %v1433_v57  ;;  %1534 = vst [vmem:[%s3212_s2 + $0x18] sm:$0xff] %v1502_v58  ;;  %v1876_v61 = vpop.f32.mrb[8].mxu0  ;;  %v1924_v62 = vpop.f32.mrb[8].mxu1 }
 0x299   : > { %1459 = vst [vmem:[#allocation4 + $0x48] sm:$0xff] %v1441_v59  ;;  %1550 = vst [vmem:[%s3212_s2 + $0x98] sm:$0xff] %v1518_v60  ;;  %v1877_v63 = vpop.f32.mrb[9].mxu0  ;;  %v1925_v33 = vpop.f32.mrb[9].mxu1 }
 0x29a   : > { %v1878_v35 = vadd.f32 %v1877_v63, %v1876_v61  ;;  %v1926_v36 = vadd.f32 %v1925_v33, %v1924_v62  ;;  %v1879_v37 = vpop.f32.mrb[10].mxu0  ;;  %v1927_v38 = vpop.f32.mrb[10].mxu1 }
 0x29b   : > { %v1880_v39 = vpop.f32.mrb[11].mxu0  ;;  %v1928_v18 = vpop.f32.mrb[11].mxu1 }
 0x29c   : > { %v1503_v41 = vadd.f32 %v1878_v35, %v1471_v0  ;;  %v1519_v42 = vadd.f32 %v1926_v36, %v1487_v34  ;;  %v1881_v43 = vadd.f32 %v1880_v39, %v1879_v37  ;;  %v1929_v44 = vadd.f32 %v1928_v18, %v1927_v38  ;;  %v1477_v34 = vld [vmem:[%s3212_s2 + $0x50] sm:$0xff] }
 0x29e   : > { %1535 = vst [vmem:[%s3212_s2 + $0x20] sm:$0xff] %v1503_v41  ;;  %1551 = vst [vmem:[%s3212_s2 + $0xa0] sm:$0xff] %v1519_v42  ;;  %v1434_v45 = vpack.c.bf16 %v1881_v43, %v1878_v35  ;;  %v1504_v46 = vadd.f32 %v1881_v43, %v1472_v2  ;;  %v1442_v1 = vpack.c.bf16 %v1929_v44, %v1926_v36  ;;  %v1493_v36 = vld [vmem:[%s3212_s2 + $0xd0] sm:$0xff]  ;;  %v1494_v42 = vld [vmem:[%s3212_s2 + $0xd8] sm:$0xff] }
 0x29f   : > { %v1520_v3 = vadd.f32 %v1929_v44, %v1488_v40  ;;  %v1478_v40 = vld [vmem:[%s3212_s2 + $0x58] sm:$0xff] }
 0x2a0   : > { %1452 = vst [vmem:[#allocation4 + $0x10] sm:$0xff] %v1434_v45  ;;  %1536 = vst [vmem:[%s3212_s2 + $0x28] sm:$0xff] %v1504_v46  ;;  %v1882_v4 = vpop.f32.mrb[12].mxu0  ;;  %v1930_v5 = vpop.f32.mrb[12].mxu1 }
 0x2a1   : > { %1460 = vst [vmem:[#allocation4 + $0x50] sm:$0xff] %v1442_v1  ;;  %1552 = vst [vmem:[%s3212_s2 + $0xa8] sm:$0xff] %v1520_v3  ;;  %v1883_v6 = vpop.f32.mrb[13].mxu0  ;;  %v1931_v8 = vpop.f32.mrb[13].mxu1 }
 0x2a2   : > { %v1884_v10 = vadd.f32 %v1883_v6, %v1882_v4  ;;  %v1932_v11 = vadd.f32 %v1931_v8, %v1930_v5  ;;  %v1885_v12 = vpop.f32.mrb[14].mxu0  ;;  %v1933_v13 = vpop.f32.mrb[14].mxu1 }
 0x2a3   : > { %v1886_v14 = vpop.f32.mrb[15].mxu0  ;;  %v1934_v16 = vpop.f32.mrb[15].mxu1 }
 0x2a4   : > { %v1505_v19 = vadd.f32 %v1884_v10, %v1473_v7  ;;  %v1521_v20 = vadd.f32 %v1932_v11, %v1489_v9  ;;  %v1887_v21 = vadd.f32 %v1886_v14, %v1885_v12  ;;  %v1935_v22 = vadd.f32 %v1934_v16, %v1933_v13  ;;  %v1479_v9 = vld [vmem:[%s3212_s2 + $0x60] sm:$0xff] }
 0x2a6   : > { %1537 = vst [vmem:[%s3212_s2 + $0x30] sm:$0xff] %v1505_v19  ;;  %1553 = vst [vmem:[%s3212_s2 + $0xb0] sm:$0xff] %v1521_v20  ;;  %v1435_v23 = vpack.c.bf16 %v1887_v21, %v1884_v10  ;;  %v1506_v24 = vadd.f32 %v1887_v21, %v1474_v15  ;;  %v1443_v25 = vpack.c.bf16 %v1935_v22, %v1932_v11  ;;  %v1495_v11 = vld [vmem:[%s3212_s2 + $0xe0] sm:$0xff]  ;;  %v1496_v20 = vld [vmem:[%s3212_s2 + $0xe8] sm:$0xff] }
 0x2a7   : > { %v1522_v26 = vadd.f32 %v1935_v22, %v1490_v17  ;;  %v1480_v17 = vld [vmem:[%s3212_s2 + $0x68] sm:$0xff] }
 0x2a8   : > { %1453 = vst [vmem:[#allocation4 + $0x18] sm:$0xff] %v1435_v23  ;;  %1538 = vst [vmem:[%s3212_s2 + $0x38] sm:$0xff] %v1506_v24  ;;  %v1888_v27 = vpop.f32.mrb[16].mxu0  ;;  %v1936_v28 = vpop.f32.mrb[16].mxu1 }
 0x2a9   : > { %1461 = vst [vmem:[#allocation4 + $0x58] sm:$0xff] %v1443_v25  ;;  %1554 = vst [vmem:[%s3212_s2 + $0xb8] sm:$0xff] %v1522_v26  ;;  %v1889_v29 = vpop.f32.mrb[17].mxu0  ;;  %v1937_v31 = vpop.f32.mrb[17].mxu1 }
 0x2aa   : > { %v1890_v47 = vadd.f32 %v1889_v29, %v1888_v27  ;;  %v1938_v48 = vadd.f32 %v1937_v31, %v1936_v28  ;;  %v1891_v49 = vpop.f32.mrb[18].mxu0  ;;  %v1939_v50 = vpop.f32.mrb[18].mxu1 }
 0x2ab   : > { %v1892_v51 = vpop.f32.mrb[19].mxu0  ;;  %v1940_v53 = vpop.f32.mrb[19].mxu1 }
 0x2ac   : > { %v1507_v55 = vadd.f32 %v1890_v47, %v1475_v30  ;;  %v1523_v56 = vadd.f32 %v1938_v48, %v1491_v32  ;;  %v1893_v57 = vadd.f32 %v1892_v51, %v1891_v49  ;;  %v1941_v58 = vadd.f32 %v1940_v53, %v1939_v50  ;;  %v1481_v32 = vld [vmem:[%s3212_s2 + $0x70] sm:$0xff] }
 0x2ae   : > { %1539 = vst [vmem:[%s3212_s2 + $0x40] sm:$0xff] %v1507_v55  ;;  %1555 = vst [vmem:[%s3212_s2 + $0xc0] sm:$0xff] %v1523_v56  ;;  %v1436_v59 = vpack.c.bf16 %v1893_v57, %v1890_v47  ;;  %v1508_v60 = vadd.f32 %v1893_v57, %v1476_v52  ;;  %v1444_v61 = vpack.c.bf16 %v1941_v58, %v1938_v48  ;;  %v1497_v48 = vld [vmem:[%s3212_s2 + $0xf0] sm:$0xff]  ;;  %v1498_v56 = vld [vmem:[%s3212_s2 + $0xf8] sm:$0xff] }
 0x2af   : > { %v1524_v62 = vadd.f32 %v1941_v58, %v1492_v54  ;;  %v1482_v54 = vld [vmem:[%s3212_s2 + $0x78] sm:$0xff] }
 0x2b0   : > { %1454 = vst [vmem:[#allocation4 + $0x20] sm:$0xff] %v1436_v59  ;;  %1540 = vst [vmem:[%s3212_s2 + $0x48] sm:$0xff] %v1508_v60  ;;  %v1894_v63 = vpop.f32.mrb[20].mxu0  ;;  %v1942_v0 = vpop.f32.mrb[20].mxu1 }
 0x2b1   : > { %1462 = vst [vmem:[#allocation4 + $0x60] sm:$0xff] %v1444_v61  ;;  %1556 = vst [vmem:[%s3212_s2 + $0xc8] sm:$0xff] %v1524_v62  ;;  %v1895_v33 = vpop.f32.mrb[21].mxu0  ;;  %v1943_v35 = vpop.f32.mrb[21].mxu1 }
 0x2b2   : > { %v1896_v37 = vadd.f32 %v1895_v33, %v1894_v63  ;;  %v1944_v38 = vadd.f32 %v1943_v35, %v1942_v0  ;;  %v1897_v39 = vpop.f32.mrb[22].mxu0  ;;  %v1945_v2 = vpop.f32.mrb[22].mxu1 }
 0x2b3   : > { %v1898_v18 = vpop.f32.mrb[23].mxu0  ;;  %v1946_v41 = vpop.f32.mrb[23].mxu1 }
 0x2b4   : > { %v1509_v43 = vadd.f32 %v1896_v37, %v1477_v34  ;;  %v1525_v44 = vadd.f32 %v1944_v38, %v1493_v36  ;;  %v1899_v45 = vadd.f32 %v1898_v18, %v1897_v39  ;;  %v1947_v46 = vadd.f32 %v1946_v41, %v1945_v2 }
 0x2b6   : > { %1541 = vst [vmem:[%s3212_s2 + $0x50] sm:$0xff] %v1509_v43  ;;  %1557 = vst [vmem:[%s3212_s2 + $0xd0] sm:$0xff] %v1525_v44  ;;  %v1437_v1 = vpack.c.bf16 %v1899_v45, %v1896_v37  ;;  %v1510_v3 = vadd.f32 %v1899_v45, %v1478_v40  ;;  %v1445_v4 = vpack.c.bf16 %v1947_v46, %v1944_v38 }
 0x2b7   : > { %v1526_v5 = vadd.f32 %v1947_v46, %v1494_v42 }
 0x2b8   : > { %1455 = vst [vmem:[#allocation4 + $0x28] sm:$0xff] %v1437_v1  ;;  %1542 = vst [vmem:[%s3212_s2 + $0x58] sm:$0xff] %v1510_v3  ;;  %v1900_v6 = vpop.f32.mrb[24].mxu0  ;;  %v1948_v7 = vpop.f32.mrb[24].mxu1 }
 0x2b9   : > { %1463 = vst [vmem:[#allocation4 + $0x68] sm:$0xff] %v1445_v4  ;;  %1558 = vst [vmem:[%s3212_s2 + $0xd8] sm:$0xff] %v1526_v5  ;;  %v1901_v8 = vpop.f32.mrb[25].mxu0  ;;  %v1949_v10 = vpop.f32.mrb[25].mxu1 }
 0x2ba   : > { %v1902_v12 = vadd.f32 %v1901_v8, %v1900_v6  ;;  %v1950_v13 = vadd.f32 %v1949_v10, %v1948_v7  ;;  %v1903_v14 = vpop.f32.mrb[26].mxu0  ;;  %v1951_v15 = vpop.f32.mrb[26].mxu1 }
 0x2bb   : > { %v1904_v16 = vpop.f32.mrb[27].mxu0  ;;  %v1952_v19 = vpop.f32.mrb[27].mxu1 }
 0x2bc   : > { %v1511_v21 = vadd.f32 %v1902_v12, %v1479_v9  ;;  %v1527_v22 = vadd.f32 %v1950_v13, %v1495_v11  ;;  %v1905_v23 = vadd.f32 %v1904_v16, %v1903_v14  ;;  %v1953_v24 = vadd.f32 %v1952_v19, %v1951_v15 }
 0x2be   : > { %1543 = vst [vmem:[%s3212_s2 + $0x60] sm:$0xff] %v1511_v21  ;;  %1559 = vst [vmem:[%s3212_s2 + $0xe0] sm:$0xff] %v1527_v22  ;;  %v1438_v25 = vpack.c.bf16 %v1905_v23, %v1902_v12  ;;  %v1512_v26 = vadd.f32 %v1905_v23, %v1480_v17  ;;  %v1446_v27 = vpack.c.bf16 %v1953_v24, %v1950_v13 }
 0x2bf   : > { %v1528_v28 = vadd.f32 %v1953_v24, %v1496_v20 }
 0x2c0   : > { %1456 = vst [vmem:[#allocation4 + $0x30] sm:$0xff] %v1438_v25  ;;  %1544 = vst [vmem:[%s3212_s2 + $0x68] sm:$0xff] %v1512_v26  ;;  %v1906_v29 = vpop.f32.mrb[28].mxu0  ;;  %v1954_v30 = vpop.f32.mrb[28].mxu1 }
 0x2c1   : > { %1464 = vst [vmem:[#allocation4 + $0x70] sm:$0xff] %v1446_v27  ;;  %1560 = vst [vmem:[%s3212_s2 + $0xe8] sm:$0xff] %v1528_v28  ;;  %v1907_v31 = vpop.f32.mrb[29].mxu0  ;;  %v1955_v47 = vpop.f32.mrb[29].mxu1 }
 0x2c2   : > { %v1908_v49 = vadd.f32 %v1907_v31, %v1906_v29  ;;  %v1956_v50 = vadd.f32 %v1955_v47, %v1954_v30  ;;  %v1909_v51 = vpop.f32.mrb[30].mxu0  ;;  %v1957_v52 = vpop.f32.mrb[30].mxu1 }
 0x2c3   : > { %v1910_v53 = vpop.f32.mrb[31].mxu0  ;;  %v1958_v55 = vpop.f32.mrb[31].mxu1 }
 0x2c4   : > { %v1513_v57 = vadd.f32 %v1908_v49, %v1481_v32  ;;  %v1529_v58 = vadd.f32 %v1956_v50, %v1497_v48  ;;  %v1911_v59 = vadd.f32 %v1910_v53, %v1909_v51  ;;  %v1959_v60 = vadd.f32 %v1958_v55, %v1957_v52 }
 0x2c6   : > { %1545 = vst [vmem:[%s3212_s2 + $0x70] sm:$0xff] %v1513_v57  ;;  %1561 = vst [vmem:[%s3212_s2 + $0xf0] sm:$0xff] %v1529_v58  ;;  %v1439_v61 = vpack.c.bf16 %v1911_v59, %v1908_v49  ;;  %v1514_v62 = vadd.f32 %v1911_v59, %v1482_v54  ;;  %v1447_v63 = vpack.c.bf16 %v1959_v60, %v1956_v50 }
 0x2c7   : > { %v1530_v0 = vadd.f32 %v1959_v60, %v1498_v56 }
 0x2c8   : > { %1457 = vst [vmem:[#allocation4 + $0x38] sm:$0xff] %v1439_v61  ;;  %1546 = vst [vmem:[%s3212_s2 + $0x78] sm:$0xff] %v1514_v62 }
 0x2c9   : > { %1465 = vst [vmem:[#allocation4 + $0x78] sm:$0xff] %v1447_v63  ;;  %1562 = vst [vmem:[%s3212_s2 + $0xf8] sm:$0xff] %v1530_v0 }
 0x2ca PF: > { %p1563_p6 = scmp.eq.s32.totalorder %s2022_s9, 2 }
 0x2cb   : > { %v1569_v33 = vld [vmem:[%s3212_s2] sm:$0xff] (%p1563_p6)  ;;  %v1570_v34 = vld [vmem:[%s3212_s2 + $0x8] sm:$0xff] (%p1563_p6)  ;;  %v1571_v35 = vld [vmem:[%s3212_s2 + $0x10] sm:$0xff] (%p1563_p6) }
 0x2cc   : > { %1567 = sbr.rel (!%p1563_p6) target bundleno = 734 (0x2de), region = 125  ;;  %v1601_v36 = vmul.f32 (%p1563_p6), 0.25, %v1569_v33  ;;  %v1602_v37 = vmul.f32 (%p1563_p6), 0.25, %v1570_v34  ;;  %v1603_v38 = vmul.f32 (%p1563_p6), 0.25, %v1571_v35  ;;  %v1572_v39 = vld [vmem:[%s3212_s2 + $0x18] sm:$0xff] (%p1563_p6)  ;;  %v1573_v2 = vld [vmem:[%s3212_s2 + $0x20] sm:$0xff] (%p1563_p6) }
 0x2cd   : > { %v1574_v18 = vld [vmem:[%s3212_s2 + $0x28] sm:$0xff] (%p1563_p6)  ;;  %v1604_v40 = vmul.f32 (%p1563_p6), 0.25, %v1572_v39  ;;  %v1605_v41 = vmul.f32 (%p1563_p6), 0.25, %v1573_v2  ;;  %v1575_v43 = vld [vmem:[%s3212_s2 + $0x30] sm:$0xff] (%p1563_p6)  ;;  %v1576_v44 = vld [vmem:[%s3212_s2 + $0x38] sm:$0xff] (%p1563_p6) }
 0x2ce   : > { %v1606_v42 = vmul.f32 (%p1563_p6), 0.25, %v1574_v18  ;;  %v1577_v45 = vld [vmem:[%s3212_s2 + $0x40] sm:$0xff] (%p1563_p6)  ;;  %1633 = vst [vmem:[%s3212_s2] sm:$0xff] (%p1563_p6), %v1601_v36  ;;  %1634 = vst [vmem:[%s3212_s2 + $0x8] sm:$0xff] (%p1563_p6), %v1602_v37  ;;  %v1607_v46 = vmul.f32 (%p1563_p6), 0.25, %v1575_v43  ;;  %v1608_v1 = vmul.f32 (%p1563_p6), 0.25, %v1576_v44  ;;  %v1578_v4 = vld [vmem:[%s3212_s2 + $0x48] sm:$0xff] (%p1563_p6) }
 0x2cf   : > { %1635 = vst [vmem:[%s3212_s2 + $0x10] sm:$0xff] (%p1563_p6), %v1603_v38  ;;  %v1609_v3 = vmul.f32 (%p1563_p6), 0.25, %v1577_v45  ;;  %v1579_v5 = vld [vmem:[%s3212_s2 + $0x50] sm:$0xff] (%p1563_p6)  ;;  %v1580_v6 = vld [vmem:[%s3212_s2 + $0x58] sm:$0xff] (%p1563_p6)  ;;  %1636 = vst [vmem:[%s3212_s2 + $0x18] sm:$0xff] (%p1563_p6), %v1604_v40  ;;  %v1610_v7 = vmul.f32 (%p1563_p6), 0.25, %v1578_v4 }
 0x2d0   : > { %1637 = vst [vmem:[%s3212_s2 + $0x20] sm:$0xff] (%p1563_p6), %v1605_v41  ;;  %1638 = vst [vmem:[%s3212_s2 + $0x28] sm:$0xff] (%p1563_p6), %v1606_v42  ;;  %v1611_v8 = vmul.f32 (%p1563_p6), 0.25, %v1579_v5  ;;  %v1612_v9 = vmul.f32 (%p1563_p6), 0.25, %v1580_v6  ;;  %v1581_v10 = vld [vmem:[%s3212_s2 + $0x60] sm:$0xff] (%p1563_p6)  ;;  %v1582_v11 = vld [vmem:[%s3212_s2 + $0x68] sm:$0xff] (%p1563_p6) }
 0x2d1   : > { %v1583_v12 = vld [vmem:[%s3212_s2 + $0x70] sm:$0xff] (%p1563_p6)  ;;  %1639 = vst [vmem:[%s3212_s2 + $0x30] sm:$0xff] (%p1563_p6), %v1607_v46  ;;  %1640 = vst [vmem:[%s3212_s2 + $0x38] sm:$0xff] (%p1563_p6), %v1608_v1  ;;  %v1613_v13 = vmul.f32 (%p1563_p6), 0.25, %v1581_v10  ;;  %v1614_v14 = vmul.f32 (%p1563_p6), 0.25, %v1582_v11  ;;  %v1584_v16 = vld [vmem:[%s3212_s2 + $0x78] sm:$0xff] (%p1563_p6) }
 0x2d2   : > { %1641 = vst [vmem:[%s3212_s2 + $0x40] sm:$0xff] (%p1563_p6), %v1609_v3  ;;  %v1615_v15 = vmul.f32 (%p1563_p6), 0.25, %v1583_v12  ;;  %v1585_v17 = vld [vmem:[%s3212_s2 + $0x80] sm:$0xff] (%p1563_p6)  ;;  %v1586_v19 = vld [vmem:[%s3212_s2 + $0x88] sm:$0xff] (%p1563_p6)  ;;  %1642 = vst [vmem:[%s3212_s2 + $0x48] sm:$0xff] (%p1563_p6), %v1610_v7  ;;  %v1616_v20 = vmul.f32 (%p1563_p6), 0.25, %v1584_v16 }
 0x2d3   : > { %1643 = vst [vmem:[%s3212_s2 + $0x50] sm:$0xff] %v1611_v8  ;;  %1644 = vst [vmem:[%s3212_s2 + $0x58] sm:$0xff] %v1612_v9  ;;  %v1617_v21 = vmul.f32 0.25, %v1585_v17  ;;  %v1618_v22 = vmul.f32 0.25, %v1586_v19  ;;  %v1587_v23 = vld [vmem:[%s3212_s2 + $0x90] sm:$0xff]  ;;  %v1588_v24 = vld [vmem:[%s3212_s2 + $0x98] sm:$0xff] }
 0x2d4   : > { %v1589_v25 = vld [vmem:[%s3212_s2 + $0xa0] sm:$0xff]  ;;  %1645 = vst [vmem:[%s3212_s2 + $0x60] sm:$0xff] %v1613_v13  ;;  %1646 = vst [vmem:[%s3212_s2 + $0x68] sm:$0xff] %v1614_v14  ;;  %v1619_v26 = vmul.f32 0.25, %v1587_v23  ;;  %v1620_v27 = vmul.f32 0.25, %v1588_v24  ;;  %v1590_v29 = vld [vmem:[%s3212_s2 + $0xa8] sm:$0xff] }
 0x2d5   : > { %1647 = vst [vmem:[%s3212_s2 + $0x70] sm:$0xff] %v1615_v15  ;;  %v1621_v28 = vmul.f32 0.25, %v1589_v25  ;;  %v1591_v30 = vld [vmem:[%s3212_s2 + $0xb0] sm:$0xff]  ;;  %v1592_v31 = vld [vmem:[%s3212_s2 + $0xb8] sm:$0xff]  ;;  %1648 = vst [vmem:[%s3212_s2 + $0x78] sm:$0xff] %v1616_v20  ;;  %v1622_v32 = vmul.f32 0.25, %v1590_v29 }
 0x2d6   : > { %1649 = vst [vmem:[%s3212_s2 + $0x80] sm:$0xff] %v1617_v21  ;;  %1650 = vst [vmem:[%s3212_s2 + $0x88] sm:$0xff] %v1618_v22  ;;  %v1623_v47 = vmul.f32 0.25, %v1591_v30  ;;  %v1624_v48 = vmul.f32 0.25, %v1592_v31  ;;  %v1593_v49 = vld [vmem:[%s3212_s2 + $0xc0] sm:$0xff]  ;;  %v1594_v50 = vld [vmem:[%s3212_s2 + $0xc8] sm:$0xff] }
 0x2d7   : > { %v1595_v51 = vld [vmem:[%s3212_s2 + $0xd0] sm:$0xff]  ;;  %1651 = vst [vmem:[%s3212_s2 + $0x90] sm:$0xff] %v1619_v26  ;;  %1652 = vst [vmem:[%s3212_s2 + $0x98] sm:$0xff] %v1620_v27  ;;  %v1625_v52 = vmul.f32 0.25, %v1593_v49  ;;  %v1626_v53 = vmul.f32 0.25, %v1594_v50  ;;  %v1596_v55 = vld [vmem:[%s3212_s2 + $0xd8] sm:$0xff] }
 0x2d8   : > { %1653 = vst [vmem:[%s3212_s2 + $0xa0] sm:$0xff] %v1621_v28  ;;  %v1627_v54 = vmul.f32 0.25, %v1595_v51  ;;  %v1597_v56 = vld [vmem:[%s3212_s2 + $0xe0] sm:$0xff]  ;;  %v1598_v57 = vld [vmem:[%s3212_s2 + $0xe8] sm:$0xff]  ;;  %1654 = vst [vmem:[%s3212_s2 + $0xa8] sm:$0xff] %v1622_v32  ;;  %v1628_v58 = vmul.f32 0.25, %v1596_v55 }
 0x2d9   : > { %1655 = vst [vmem:[%s3212_s2 + $0xb0] sm:$0xff] %v1623_v47  ;;  %1656 = vst [vmem:[%s3212_s2 + $0xb8] sm:$0xff] %v1624_v48  ;;  %v1629_v59 = vmul.f32 0.25, %v1597_v56  ;;  %v1630_v60 = vmul.f32 0.25, %v1598_v57  ;;  %v1599_v61 = vld [vmem:[%s3212_s2 + $0xf0] sm:$0xff]  ;;  %v1600_v62 = vld [vmem:[%s3212_s2 + $0xf8] sm:$0xff] }
 0x2da   : > { %1657 = vst [vmem:[%s3212_s2 + $0xc0] sm:$0xff] %v1625_v52  ;;  %1658 = vst [vmem:[%s3212_s2 + $0xc8] sm:$0xff] %v1626_v53  ;;  %v1631_v63 = vmul.f32 0.25, %v1599_v61  ;;  %v1632_v0 = vmul.f32 0.25, %v1600_v62 }
 0x2db   : > { %1659 = vst [vmem:[%s3212_s2 + $0xd0] sm:$0xff] %v1627_v54  ;;  %1660 = vst [vmem:[%s3212_s2 + $0xd8] sm:$0xff] %v1628_v58 }
 0x2dc   : > { %1661 = vst [vmem:[%s3212_s2 + $0xe0] sm:$0xff] %v1629_v59  ;;  %1662 = vst [vmem:[%s3212_s2 + $0xe8] sm:$0xff] %v1630_v60 }
 0x2dd   : > { %1663 = vst [vmem:[%s3212_s2 + $0xf0] sm:$0xff] %v1631_v63  ;;  %1664 = vst [vmem:[%s3212_s2 + $0xf8] sm:$0xff] %v1632_v0 }
 0x2de PF: > { %s12_s10 = sadd.s32 1, %s2026_s10   ;;  %s3213_s9 = smov %s3215_s11 }
 0x2df   : > { %p9_p7 = scmp.ge.s32.totalorder %s12_s10, 4  }
 0x2e1   :  { %11 = sbr.rel (!%p9_p7) target bundleno = 1 (0x1), region = 178 }

</bundles_post_ra>
